<compile_context>
chip_gen: v7x
topology: tpu7x:2x2x1
jax: 0.10.0
libtpu: 0.0.40
codegen_flags: <defaults>
</compile_context>

<pallas_src>
import functools
import math

import jax
import jax.numpy as jnp
from jax.experimental import pallas as pl
from jax.experimental.pallas import tpu as pltpu


# Abramowitz & Stegun 7.1.26 erf constants (max abs erf err ~1.5e-7),
# pre-folded for the GELU form
#   gelu(x) = max(x, 0) - |x| * halfpoly(t) * exp(-x^2/2)
#   t = 1 / (1 + P_S*|x|),  P_S = p/sqrt(2),  halfpoly = 0.5 * poly.
_P_S = 0.3275911 / math.sqrt(2.0)
_A1H = 0.5 * 0.254829592
_A2H = 0.5 * -0.284496736
_A3H = 0.5 * 1.421413741
_A4H = 0.5 * -1.453152027
_A5H = 0.5 * 1.061405429


def _gelu_erf(x, *, approx_recip):
    """Exact-erf GELU without sign/select; the divide goes to the EUP."""
    ax = jnp.abs(x)
    t = pl.reciprocal(1.0 + _P_S * ax, approx=approx_recip)
    halfpoly = ((((_A5H * t + _A4H) * t + _A3H) * t + _A2H) * t + _A1H) * t
    return jnp.maximum(x, 0.0) - ax * halfpoly * jnp.exp(-0.5 * x * x)


def attention_kernel(*refs, seq_len, matmul_dtype, approx_recip, pos_is_input):
    if pos_is_input:
        pos = refs[0][...]                    # (1, Nt) int32 per-lane position
        refs = refs[1:]
    (x_ref, w_p1_ref, b_p1_ref, w_c0_ref, b_c0_ref, w_cs_ref, b_cs_ref,
     w_c1_ref, b_c1_ref, w_p2_ref, b_p2_ref, o_ref) = refs

    x = x_ref[...].astype(jnp.float32)        # (C, Nt), Nt = Bt * seq_len
    C, Nt = x.shape

    if not pos_is_input:
        # Position of each lane inside its own length-`seq_len` sequence
        # (several batch elements are folded along the lane axis).  Only used
        # when seq_len is a power of two.
        pos = jax.lax.broadcasted_iota(jnp.int32, (1, Nt), 1) & (seq_len - 1)

    def pw(w_ref, b_ref, t):
        # 1x1 conv == channel-mixing matmul.  Weights pre-cast in the wrapper;
        # f32 accumulation; bias added in f32.
        return jnp.dot(w_ref[...], t.astype(matmul_dtype),
                       preferred_element_type=jnp.float32) + b_ref[...]

    def dwconv(t, w_ref, b_ref, ksize, dil):
        # Depthwise conv (groups == channels).  Every non-center tap is an XLU
        # roll of the whole tile.  Validity is a single compare at (1, Nt)
        # width per tap (d<0 -> left edge only, d>0 -> right edge only); the
        # f32 mask broadcast-multiplies the tap, which also stops leakage
        # across folded batch boundaries and the tile-edge roll wrap-around.
        w = w_ref[...]                                   # (C, ksize)
        center = ksize // 2
        acc = w[:, center:center + 1] * t + b_ref[...]   # center tap + bias
        for k in range(ksize):
            d = (k - center) * dil                       # tap offset
            if d == 0:
                continue
            tap = pltpu.roll(t, (-d) % Nt, axis=1)       # tap[i] = t[i + d]
            valid = (pos >= -d) if d < 0 else (pos < seq_len - d)
            acc = acc + w[:, k:k + 1] * (tap * valid.astype(jnp.float32))
        return acc

    # ---- proj_1 -> exact GELU ----
    v = pw(w_p1_ref, b_p1_ref, x)
    v = _gelu_erf(v, approx_recip=approx_recip)          # DDCA's "u = x.clone()"

    # ---- DDCA ----
    attn = dwconv(v, w_c0_ref, b_c0_ref, ksize=5, dil=1)     # k=5, pad=2
    attn = dwconv(attn, w_cs_ref, b_cs_ref, ksize=7, dil=3)  # k=7, dil=3, pad=9
    attn = pw(w_c1_ref, b_c1_ref, attn)                      # 1x1 conv
    g = v * attn                                             # gate (f32)

    # ---- proj_2 + residual ----
    y = pw(w_p2_ref, b_p2_ref, g)
    o_ref[...] = (y + x).astype(o_ref.dtype)


def _tpu_budgets():
    """Generation-aware (fold_budget_bytes, vmem_limit_bytes, prefer_multi_step)."""
    vmem_cap = 128 * 1024 * 1024
    try:
        vmem_cap = int(getattr(pltpu.get_tpu_info(), "vmem_capacity_bytes",
                               vmem_cap))
    except Exception:
        pass
    two_tensorcores = False
    try:
        kind = jax.devices()[0].device_kind.lower()
        two_tensorcores = ("v7" in kind) or ("7x" in kind)
    except Exception:
        pass
    if two_tensorcores or vmem_cap <= 64 * 1024 * 1024:
        # v7x-like: 64 MiB per TensorCore, 2 TCs fed via the "parallel" grid
        # axis -> keep >= 2 steps and cap the per-step footprint.
        return 24 * 1024 * 1024, 48 * 1024 * 1024, True
    # Single-TensorCore 128 MiB chips (v5e / v6e): extra grid steps are pure
    # ~0.35us/step overhead, so take the biggest lane-dense fold that fits.
    return 64 * 1024 * 1024, 96 * 1024 * 1024, False


def _pick_batch_fold(B, C, L, vmem_budget_bytes, prefer_multi_step):
    """Largest batch fold Bt (divisor of B) whose per-step footprint fits the
    budget, preferring 128-aligned folded lane dims (unmasked vst) and -- on
    2-TensorCore chips -- at least 2 grid steps so both cores get work."""
    per_batch = C * L * 4 * 14        # ~live f32 intermediates + 2x2 IO buffers
    max_fold = min(B, max(1, vmem_budget_bytes // max(per_batch, 1)))
    divisors = [d for d in range(1, B + 1) if B % d == 0 and d <= max_fold]
    aligned = [d for d in divisors if (d * L) % 128 == 0 or d == B]
    # Prefer full-lane stores; otherwise take the largest fold that still fits
    # the budget (masked vst) rather than a whole-batch block.
    cand = aligned if aligned else divisors
    # TODO(synk): when even Bt=1 exceeds the budget (huge C*L), add an L-tiled
    # grid axis with an 11-element halo (2 for the k=5 conv + 9 for the
    # dilated k=7 conv) instead of leaning on a raised vmem limit.
    if prefer_multi_step:
        multi = [d for d in cand if B // d >= 2]
        if multi:
            return max(multi)
    return max(cand)


def attention_forward(x, params, *, matmul_dtype=None, approx_recip=True):
    B, C, L = x.shape
    (w_p1, b_p1, w_c0, b_c0, w_cs, b_cs, w_c1, b_c1, w_p2, b_p2) = params

    # With small C the MXU contraction is noise (K=C of a 256-wide array) and
    # bf16 only adds cast passes on the saturated VALU slot -> default f32.
    if matmul_dtype is None:
        matmul_dtype = jnp.bfloat16 if C >= 128 else jnp.float32

    fold_budget, vmem_limit, prefer_multi = _tpu_budgets()
    Bt = _pick_batch_fold(B, C, L, fold_budget, prefer_multi)
    Nt = Bt * L
    n_steps = B // Bt

    # Layout plumbing: fold batch into the lane axis so the kernel sees
    # lane-dense tiles and produces lane-dense (full-vst) stores.
    x_flat = jnp.transpose(x, (1, 0, 2)).reshape(C, B * L)

    # Pre-cast the channel-mixing weights once in the wrapper (no in-kernel
    # cast passes; for bf16 also halves their HBM/VMEM bytes).
    w_p1c = w_p1.astype(matmul_dtype)
    w_c1c = w_c1.astype(matmul_dtype)
    w_p2c = w_p2.astype(matmul_dtype)

    pos_is_input = (L & (L - 1)) != 0   # in-kernel iota mask needs pow-2 L

    # Resident constants don't need a second pipeline buffer; only worth it
    # once the weights are non-trivially sized (production C).
    const_pipeline = pl.Buffered(1) if C >= 128 else None

    def const_spec(shape):
        if const_pipeline is None:
            return pl.BlockSpec(shape, lambda b: (0, 0))
        return pl.BlockSpec(shape, lambda b: (0, 0),
                            pipeline_mode=const_pipeline)

    in_specs = []
    args = []
    if pos_is_input:
        pos_row = jnp.tile(jnp.arange(L, dtype=jnp.int32), B)[None, :]
        in_specs.append(pl.BlockSpec((1, Nt), lambda b: (0, b)))
        args.append(pos_row)
    in_specs += [
        pl.BlockSpec((C, Nt), lambda b: (0, b)),        # x tile
        const_spec((C, C)), const_spec((C, 1)),         # proj_1
        const_spec((C, 5)), const_spec((C, 1)),         # DDCA.conv0
        const_spec((C, 7)), const_spec((C, 1)),         # DDCA.conv_spatial
        const_spec((C, C)), const_spec((C, 1)),         # DDCA.conv1
        const_spec((C, C)), const_spec((C, 1)),         # proj_2
    ]
    args += [x_flat, w_p1c, b_p1, w_c0, b_c0, w_cs, b_cs, w_c1c, b_c1,
             w_p2c, b_p2]

    wbytes = jnp.dtype(matmul_dtype).itemsize
    cost = pl.CostEstimate(
        flops=3 * 2 * C * C * B * L + (3 * (4 + 6) + 6) * C * B * L,
        transcendentals=2 * C * B * L,
        bytes_accessed=4 * 2 * B * C * L + wbytes * 3 * C * C + 4 * 17 * C,
    )

    kernel = functools.partial(
        attention_kernel, seq_len=L, matmul_dtype=matmul_dtype,
        approx_recip=approx_recip, pos_is_input=pos_is_input)

    out_flat = pl.pallas_call(
        kernel,
        out_shape=jax.ShapeDtypeStruct((C, B * L), x.dtype),
        grid=(n_steps,),
        in_specs=in_specs,
        out_specs=pl.BlockSpec((C, Nt), lambda b: (0, b)),
        compiler_params=pltpu.CompilerParams(
            dimension_semantics=("parallel",),
            vmem_limit_bytes=vmem_limit),
        cost_estimate=cost,
    )(*args)

    return jnp.transpose(out_flat.reshape(C, B, L), (1, 0, 2))


def attention_reference(x, params, matmul_dtype=jnp.float32):
    """Pure-JAX reference reproducing the PyTorch forward semantics.
    `matmul_dtype` mirrors the kernel's cast-at-the-MXU-boundary option."""
    (w_p1, b_p1, w_c0, b_c0, w_cs, b_cs, w_c1, b_c1, w_p2, b_p2) = params

    def pw(w, b, t):      # 1x1 conv: (C_out, C_in) x (B, C_in, L)
        return jnp.einsum('oc,bcl->bol', w.astype(matmul_dtype),
                          t.astype(matmul_dtype),
                          preferred_element_type=jnp.float32) + b[None, :, :]

    def dw(w, b, t, pad, dil):   # depthwise conv, groups == channels
        _, C, L = t.shape
        tp = jnp.pad(t, ((0, 0), (0, 0), (pad, pad)))
        out = jnp.zeros_like(t)
        for k in range(w.shape[1]):
            out = out + w[None, :, k:k + 1] * tp[:, :, dil * k:dil * k + L]
        return out + b[None, :, :]

    v = pw(w_p1, b_p1, x)
    v = jax.nn.gelu(v, approximate=False)
    a = dw(w_c0, b_c0, v, pad=2, dil=1)
    a = dw(w_cs, b_cs, a, pad=9, dil=3)
    a = pw(w_c1, b_c1, a)
    g = v * a
    y = pw(w_p2, b_p2, g)
    return y + x


def init_params(key, C):
    # Deterministic synthetic Conv1d-shaped parameters (1x1 weights squeezed of
    # their trailing kernel dim, biases kept as (C, 1) columns).
    ks = jax.random.split(key, 10)

    def u(k, shape, fan_in):
        bound = 1.0 / math.sqrt(fan_in)
        return jax.random.uniform(k, shape, jnp.float32, -bound, bound)

    w_p1 = u(ks[0], (C, C), C);       b_p1 = u(ks[1], (C, 1), C)
    w_c0 = u(ks[2], (C, 5), 5);       b_c0 = u(ks[3], (C, 1), 5)
    w_cs = u(ks[4], (C, 7), 7);       b_cs = u(ks[5], (C, 1), 7)
    w_c1 = u(ks[6], (C, C), C);       b_c1 = u(ks[7], (C, 1), C)
    w_p2 = u(ks[8], (C, C), C);       b_p2 = u(ks[9], (C, 1), C)
    return (w_p1, b_p1, w_c0, b_c0, w_cs, b_cs, w_c1, b_c1, w_p2, b_p2)


if __name__ == "__main__":
    # batch, d_model (channels), sequence length.  L=128 keeps the folded lane
    # dim 128-aligned; B=4 allows either a 2-step (v7x, 2 TCs) or 1-step
    # (v5e/v6e) fold depending on the detected generation.
    B, C, L = 4, 8, 128
    key = jax.random.PRNGKey(0)
    kx, kp = jax.random.split(key)
    x = jax.random.normal(kx, (B, C, L), jnp.float32)
    params = init_params(kp, C)

    fwd = jax.jit(attention_forward,
                  static_argnames=("matmul_dtype", "approx_recip"))

    ref = attention_reference(x, params)

    # Exact path (f32 matmuls, full-precision reciprocal): tight check.
    out_exact = jax.block_until_ready(
        fwd(x, params, matmul_dtype=jnp.float32, approx_recip=False))
    assert out_exact.shape == (B, C, L)
    err = jnp.max(jnp.abs(out_exact - ref))
    assert jnp.allclose(out_exact, ref, atol=1e-3, rtol=1e-3), \
        f"exact-path max abs err {err}"

    # Default / optimized path: f32 matmuls (C < 128) + approx EUP reciprocal
    # in the GELU (~1e-4-level relative error, amplified by two matmuls and
    # the gate -> looser tolerance here).
    out_fast = jax.block_until_ready(fwd(x, params))
    err_fast = jnp.max(jnp.abs(out_fast - ref))
    assert jnp.allclose(out_fast, ref, atol=1e-2, rtol=1e-2), \
        f"approx-reciprocal max abs err {err_fast}"

    # bf16 MXU path (what a production-sized C would use), checked against a
    # reference that applies the same bf16 cast at the matmul boundary.
    out_bf16 = jax.block_until_ready(
        fwd(x, params, matmul_dtype=jnp.bfloat16, approx_recip=False))
    ref_bf16 = attention_reference(x, params, matmul_dtype=jnp.bfloat16)
    err16 = jnp.max(jnp.abs(out_bf16 - ref_bf16))
    assert jnp.allclose(out_bf16, ref_bf16, atol=2e-3, rtol=2e-3), \
        f"bf16 max abs err {err16}"

    print("KERNEL_OK")
</pallas_src>

<mosaic_0001>
module attributes {stable_mosaic.version = 11 : i64} {
  func.func @attention_kernel(%arg0: i32, %arg1: memref<8x512xf32, #tpu.memory_space<vmem>>, %arg2: memref<8x8xf32, #tpu.memory_space<vmem>>, %arg3: memref<8x1xf32, #tpu.memory_space<vmem>>, %arg4: memref<8x5xf32, #tpu.memory_space<vmem>>, %arg5: memref<8x1xf32, #tpu.memory_space<vmem>>, %arg6: memref<8x7xf32, #tpu.memory_space<vmem>>, %arg7: memref<8x1xf32, #tpu.memory_space<vmem>>, %arg8: memref<8x8xf32, #tpu.memory_space<vmem>>, %arg9: memref<8x1xf32, #tpu.memory_space<vmem>>, %arg10: memref<8x8xf32, #tpu.memory_space<vmem>>, %arg11: memref<8x1xf32, #tpu.memory_space<vmem>>, %arg12: memref<8x512xf32, #tpu.memory_space<vmem>>) attributes {dimension_semantics = [#tpu.dimension_semantics<parallel>], iteration_bounds = array<i64: 1>, scalar_prefetch = 0 : i64, scratch_operands = 0 : i64, tpu.core_type = #tpu.core_type<tc>, window_params = [{transform_indices = @transform_0, window_bounds = array<i64: 8, 512>}, {pipeline_mode = #tpu.pipeline_mode<synchronous>, transform_indices = @transform_1, window_bounds = array<i64: 8, 8>}, {pipeline_mode = #tpu.pipeline_mode<synchronous>, transform_indices = @transform_2, window_bounds = array<i64: 8, 1>}, {pipeline_mode = #tpu.pipeline_mode<synchronous>, transform_indices = @transform_3, window_bounds = array<i64: 8, 5>}, {pipeline_mode = #tpu.pipeline_mode<synchronous>, transform_indices = @transform_4, window_bounds = array<i64: 8, 1>}, {pipeline_mode = #tpu.pipeline_mode<synchronous>, transform_indices = @transform_5, window_bounds = array<i64: 8, 7>}, {pipeline_mode = #tpu.pipeline_mode<synchronous>, transform_indices = @transform_6, window_bounds = array<i64: 8, 1>}, {pipeline_mode = #tpu.pipeline_mode<synchronous>, transform_indices = @transform_7, window_bounds = array<i64: 8, 8>}, {pipeline_mode = #tpu.pipeline_mode<synchronous>, transform_indices = @transform_8, window_bounds = array<i64: 8, 1>}, {pipeline_mode = #tpu.pipeline_mode<synchronous>, transform_indices = @transform_9, window_bounds = array<i64: 8, 8>}, {pipeline_mode = #tpu.pipeline_mode<synchronous>, transform_indices = @transform_10, window_bounds = array<i64: 8, 1>}, {transform_indices = @transform_11, window_bounds = array<i64: 8, 512>}]} {
    %c0 = arith.constant 0 : index
    %c0_0 = arith.constant 0 : index
    %0 = vector.load %arg1[%c0, %c0_0] : memref<8x512xf32, #tpu.memory_space<vmem>>, vector<8x512xf32>
    %1 = tpu.iota {dimensions = array<i32: 1>} : vector<1x512xi32>
    %c127_i32 = arith.constant 127 : i32
    %2 = vector.broadcast %c127_i32 : i32 to vector<1x512xi32>
    %3 = arith.andi %1, %2 : vector<1x512xi32>
    %c0_1 = arith.constant 0 : index
    %c0_2 = arith.constant 0 : index
    %4 = vector.load %arg2[%c0_1, %c0_2] : memref<8x8xf32, #tpu.memory_space<vmem>>, vector<8x8xf32>
    %cst = arith.constant dense<0.000000e+00> : vector<8x512xf32>
    %5 = tpu.matmul %4, %0, %cst {dimension_numbers = #tpu.dot_dimension_numbers<[1], [0], [0], [1], [0, 0, 1, 1], [], []>} : vector<8x8xf32>, vector<8x512xf32>, vector<8x512xf32> -> vector<8x512xf32>
    %c0_3 = arith.constant 0 : index
    %c0_4 = arith.constant 0 : index
    %6 = vector.load %arg3[%c0_3, %c0_4] : memref<8x1xf32, #tpu.memory_space<vmem>>, vector<8x1xf32>
    %7 = vector.broadcast %6 : vector<8x1xf32> to vector<8x512xf32>
    %8 = arith.addf %5, %7 : vector<8x512xf32>
    %9 = math.absf %8 : vector<8x512xf32>
    %cst_5 = arith.constant 0.231641889 : f32
    %10 = vector.broadcast %cst_5 : f32 to vector<8x512xf32>
    %11 = arith.mulf %10, %9 : vector<8x512xf32>
    %cst_6 = arith.constant 1.000000e+00 : f32
    %12 = vector.broadcast %cst_6 : f32 to vector<8x512xf32>
    %13 = arith.addf %12, %11 : vector<8x512xf32>
    %14 = tpu.reciprocal %13 : vector<8x512xf32> -> vector<8x512xf32>
    %cst_7 = arith.constant 0.53070271 : f32
    %15 = vector.broadcast %cst_7 : f32 to vector<8x512xf32>
    %16 = arith.mulf %15, %14 : vector<8x512xf32>
    %cst_8 = arith.constant -0.72657603 : f32
    %17 = vector.broadcast %cst_8 : f32 to vector<8x512xf32>
    %18 = arith.addf %16, %17 : vector<8x512xf32>
    %19 = arith.mulf %18, %14 : vector<8x512xf32>
    %cst_9 = arith.constant 0.710706889 : f32
    %20 = vector.broadcast %cst_9 : f32 to vector<8x512xf32>
    %21 = arith.addf %19, %20 : vector<8x512xf32>
    %22 = arith.mulf %21, %14 : vector<8x512xf32>
    %cst_10 = arith.constant -0.142248362 : f32
    %23 = vector.broadcast %cst_10 : f32 to vector<8x512xf32>
    %24 = arith.addf %22, %23 : vector<8x512xf32>
    %25 = arith.mulf %24, %14 : vector<8x512xf32>
    %cst_11 = arith.constant 0.127414793 : f32
    %26 = vector.broadcast %cst_11 : f32 to vector<8x512xf32>
    %27 = arith.addf %25, %26 : vector<8x512xf32>
    %28 = arith.mulf %27, %14 : vector<8x512xf32>
    %cst_12 = arith.constant 0.000000e+00 : f32
    %29 = vector.broadcast %cst_12 : f32 to vector<8x512xf32>
    %30 = arith.maximumf %8, %29 : vector<8x512xf32>
    %31 = arith.mulf %9, %28 : vector<8x512xf32>
    %cst_13 = arith.constant -5.000000e-01 : f32
    %32 = vector.broadcast %cst_13 : f32 to vector<8x512xf32>
    %33 = arith.mulf %32, %8 : vector<8x512xf32>
    %34 = arith.mulf %33, %8 : vector<8x512xf32>
    %35 = math.exp %34 : vector<8x512xf32>
    %36 = arith.mulf %31, %35 : vector<8x512xf32>
    %37 = arith.subf %30, %36 : vector<8x512xf32>
    %c0_14 = arith.constant 0 : index
    %c0_15 = arith.constant 0 : index
    %38 = vector.load %arg4[%c0_14, %c0_15] : memref<8x5xf32, #tpu.memory_space<vmem>>, vector<8x5xf32>
    %39 = vector.extract_strided_slice %38 {offsets = [0, 2], sizes = [8, 1], strides = [1, 1]} : vector<8x5xf32> to vector<8x1xf32>
    %40 = vector.broadcast %39 : vector<8x1xf32> to vector<8x512xf32>
    %41 = arith.mulf %40, %37 : vector<8x512xf32>
    %c0_16 = arith.constant 0 : index
    %c0_17 = arith.constant 0 : index
    %42 = vector.load %arg5[%c0_16, %c0_17] : memref<8x1xf32, #tpu.memory_space<vmem>>, vector<8x1xf32>
    %43 = vector.broadcast %42 : vector<8x1xf32> to vector<8x512xf32>
    %44 = arith.addf %41, %43 : vector<8x512xf32>
    %c2_i32 = arith.constant 2 : i32
    %45 = tpu.dynamic_rotate %37 by %c2_i32 dim 1 : vector<8x512xf32>, i32 -> vector<8x512xf32>
    %c2_i32_18 = arith.constant 2 : i32
    %46 = vector.broadcast %c2_i32_18 : i32 to vector<1x512xi32>
    %47 = arith.cmpi sge, %3, %46 : vector<1x512xi32>
    %48 = vector.extract_strided_slice %38 {offsets = [0, 0], sizes = [8, 1], strides = [1, 1]} : vector<8x5xf32> to vector<8x1xf32>
    %49 = arith.extui %47 : vector<1x512xi1> to vector<1x512xi32>
    %50 = arith.sitofp %49 : vector<1x512xi32> to vector<1x512xf32>
    %51 = vector.broadcast %50 : vector<1x512xf32> to vector<8x512xf32>
    %52 = arith.mulf %45, %51 : vector<8x512xf32>
    %53 = vector.broadcast %48 : vector<8x1xf32> to vector<8x512xf32>
    %54 = arith.mulf %53, %52 : vector<8x512xf32>
    %55 = arith.addf %44, %54 : vector<8x512xf32>
    %c1_i32 = arith.constant 1 : i32
    %56 = tpu.dynamic_rotate %37 by %c1_i32 dim 1 : vector<8x512xf32>, i32 -> vector<8x512xf32>
    %c1_i32_19 = arith.constant 1 : i32
    %57 = vector.broadcast %c1_i32_19 : i32 to vector<1x512xi32>
    %58 = arith.cmpi sge, %3, %57 : vector<1x512xi32>
    %59 = vector.extract_strided_slice %38 {offsets = [0, 1], sizes = [8, 1], strides = [1, 1]} : vector<8x5xf32> to vector<8x1xf32>
    %60 = arith.extui %58 : vector<1x512xi1> to vector<1x512xi32>
    %61 = arith.sitofp %60 : vector<1x512xi32> to vector<1x512xf32>
    %62 = vector.broadcast %61 : vector<1x512xf32> to vector<8x512xf32>
    %63 = arith.mulf %56, %62 : vector<8x512xf32>
    %64 = vector.broadcast %59 : vector<8x1xf32> to vector<8x512xf32>
    %65 = arith.mulf %64, %63 : vector<8x512xf32>
    %66 = arith.addf %55, %65 : vector<8x512xf32>
    %c511_i32 = arith.constant 511 : i32
    %67 = tpu.dynamic_rotate %37 by %c511_i32 dim 1 : vector<8x512xf32>, i32 -> vector<8x512xf32>
    %c127_i32_20 = arith.constant 127 : i32
    %68 = vector.broadcast %c127_i32_20 : i32 to vector<1x512xi32>
    %69 = arith.cmpi slt, %3, %68 : vector<1x512xi32>
    %70 = vector.extract_strided_slice %38 {offsets = [0, 3], sizes = [8, 1], strides = [1, 1]} : vector<8x5xf32> to vector<8x1xf32>
    %71 = arith.extui %69 : vector<1x512xi1> to vector<1x512xi32>
    %72 = arith.sitofp %71 : vector<1x512xi32> to vector<1x512xf32>
    %73 = vector.broadcast %72 : vector<1x512xf32> to vector<8x512xf32>
    %74 = arith.mulf %67, %73 : vector<8x512xf32>
    %75 = vector.broadcast %70 : vector<8x1xf32> to vector<8x512xf32>
    %76 = arith.mulf %75, %74 : vector<8x512xf32>
    %77 = arith.addf %66, %76 : vector<8x512xf32>
    %c510_i32 = arith.constant 510 : i32
    %78 = tpu.dynamic_rotate %37 by %c510_i32 dim 1 : vector<8x512xf32>, i32 -> vector<8x512xf32>
    %c126_i32 = arith.constant 126 : i32
    %79 = vector.broadcast %c126_i32 : i32 to vector<1x512xi32>
    %80 = arith.cmpi slt, %3, %79 : vector<1x512xi32>
    %81 = vector.extract_strided_slice %38 {offsets = [0, 4], sizes = [8, 1], strides = [1, 1]} : vector<8x5xf32> to vector<8x1xf32>
    %82 = arith.extui %80 : vector<1x512xi1> to vector<1x512xi32>
    %83 = arith.sitofp %82 : vector<1x512xi32> to vector<1x512xf32>
    %84 = vector.broadcast %83 : vector<1x512xf32> to vector<8x512xf32>
    %85 = arith.mulf %78, %84 : vector<8x512xf32>
    %86 = vector.broadcast %81 : vector<8x1xf32> to vector<8x512xf32>
    %87 = arith.mulf %86, %85 : vector<8x512xf32>
    %88 = arith.addf %77, %87 : vector<8x512xf32>
    %c0_21 = arith.constant 0 : index
    %c0_22 = arith.constant 0 : index
    %89 = vector.load %arg6[%c0_21, %c0_22] : memref<8x7xf32, #tpu.memory_space<vmem>>, vector<8x7xf32>
    %90 = vector.extract_strided_slice %89 {offsets = [0, 3], sizes = [8, 1], strides = [1, 1]} : vector<8x7xf32> to vector<8x1xf32>
    %91 = vector.broadcast %90 : vector<8x1xf32> to vector<8x512xf32>
    %92 = arith.mulf %91, %88 : vector<8x512xf32>
    %c0_23 = arith.constant 0 : index
    %c0_24 = arith.constant 0 : index
    %93 = vector.load %arg7[%c0_23, %c0_24] : memref<8x1xf32, #tpu.memory_space<vmem>>, vector<8x1xf32>
    %94 = vector.broadcast %93 : vector<8x1xf32> to vector<8x512xf32>
    %95 = arith.addf %92, %94 : vector<8x512xf32>
    %c9_i32 = arith.constant 9 : i32
    %96 = tpu.dynamic_rotate %88 by %c9_i32 dim 1 : vector<8x512xf32>, i32 -> vector<8x512xf32>
    %c9_i32_25 = arith.constant 9 : i32
    %97 = vector.broadcast %c9_i32_25 : i32 to vector<1x512xi32>
    %98 = arith.cmpi sge, %3, %97 : vector<1x512xi32>
    %99 = vector.extract_strided_slice %89 {offsets = [0, 0], sizes = [8, 1], strides = [1, 1]} : vector<8x7xf32> to vector<8x1xf32>
    %100 = arith.extui %98 : vector<1x512xi1> to vector<1x512xi32>
    %101 = arith.sitofp %100 : vector<1x512xi32> to vector<1x512xf32>
    %102 = vector.broadcast %101 : vector<1x512xf32> to vector<8x512xf32>
    %103 = arith.mulf %96, %102 : vector<8x512xf32>
    %104 = vector.broadcast %99 : vector<8x1xf32> to vector<8x512xf32>
    %105 = arith.mulf %104, %103 : vector<8x512xf32>
    %106 = arith.addf %95, %105 : vector<8x512xf32>
    %c6_i32 = arith.constant 6 : i32
    %107 = tpu.dynamic_rotate %88 by %c6_i32 dim 1 : vector<8x512xf32>, i32 -> vector<8x512xf32>
    %c6_i32_26 = arith.constant 6 : i32
    %108 = vector.broadcast %c6_i32_26 : i32 to vector<1x512xi32>
    %109 = arith.cmpi sge, %3, %108 : vector<1x512xi32>
    %110 = vector.extract_strided_slice %89 {offsets = [0, 1], sizes = [8, 1], strides = [1, 1]} : vector<8x7xf32> to vector<8x1xf32>
    %111 = arith.extui %109 : vector<1x512xi1> to vector<1x512xi32>
    %112 = arith.sitofp %111 : vector<1x512xi32> to vector<1x512xf32>
    %113 = vector.broadcast %112 : vector<1x512xf32> to vector<8x512xf32>
    %114 = arith.mulf %107, %113 : vector<8x512xf32>
    %115 = vector.broadcast %110 : vector<8x1xf32> to vector<8x512xf32>
    %116 = arith.mulf %115, %114 : vector<8x512xf32>
    %117 = arith.addf %106, %116 : vector<8x512xf32>
    %c3_i32 = arith.constant 3 : i32
    %118 = tpu.dynamic_rotate %88 by %c3_i32 dim 1 : vector<8x512xf32>, i32 -> vector<8x512xf32>
    %c3_i32_27 = arith.constant 3 : i32
    %119 = vector.broadcast %c3_i32_27 : i32 to vector<1x512xi32>
    %120 = arith.cmpi sge, %3, %119 : vector<1x512xi32>
    %121 = vector.extract_strided_slice %89 {offsets = [0, 2], sizes = [8, 1], strides = [1, 1]} : vector<8x7xf32> to vector<8x1xf32>
    %122 = arith.extui %120 : vector<1x512xi1> to vector<1x512xi32>
    %123 = arith.sitofp %122 : vector<1x512xi32> to vector<1x512xf32>
    %124 = vector.broadcast %123 : vector<1x512xf32> to vector<8x512xf32>
    %125 = arith.mulf %118, %124 : vector<8x512xf32>
    %126 = vector.broadcast %121 : vector<8x1xf32> to vector<8x512xf32>
    %127 = arith.mulf %126, %125 : vector<8x512xf32>
    %128 = arith.addf %117, %127 : vector<8x512xf32>
    %c509_i32 = arith.constant 509 : i32
    %129 = tpu.dynamic_rotate %88 by %c509_i32 dim 1 : vector<8x512xf32>, i32 -> vector<8x512xf32>
    %c125_i32 = arith.constant 125 : i32
    %130 = vector.broadcast %c125_i32 : i32 to vector<1x512xi32>
    %131 = arith.cmpi slt, %3, %130 : vector<1x512xi32>
    %132 = vector.extract_strided_slice %89 {offsets = [0, 4], sizes = [8, 1], strides = [1, 1]} : vector<8x7xf32> to vector<8x1xf32>
    %133 = arith.extui %131 : vector<1x512xi1> to vector<1x512xi32>
    %134 = arith.sitofp %133 : vector<1x512xi32> to vector<1x512xf32>
    %135 = vector.broadcast %134 : vector<1x512xf32> to vector<8x512xf32>
    %136 = arith.mulf %129, %135 : vector<8x512xf32>
    %137 = vector.broadcast %132 : vector<8x1xf32> to vector<8x512xf32>
    %138 = arith.mulf %137, %136 : vector<8x512xf32>
    %139 = arith.addf %128, %138 : vector<8x512xf32>
    %c506_i32 = arith.constant 506 : i32
    %140 = tpu.dynamic_rotate %88 by %c506_i32 dim 1 : vector<8x512xf32>, i32 -> vector<8x512xf32>
    %c122_i32 = arith.constant 122 : i32
    %141 = vector.broadcast %c122_i32 : i32 to vector<1x512xi32>
    %142 = arith.cmpi slt, %3, %141 : vector<1x512xi32>
    %143 = vector.extract_strided_slice %89 {offsets = [0, 5], sizes = [8, 1], strides = [1, 1]} : vector<8x7xf32> to vector<8x1xf32>
    %144 = arith.extui %142 : vector<1x512xi1> to vector<1x512xi32>
    %145 = arith.sitofp %144 : vector<1x512xi32> to vector<1x512xf32>
    %146 = vector.broadcast %145 : vector<1x512xf32> to vector<8x512xf32>
    %147 = arith.mulf %140, %146 : vector<8x512xf32>
    %148 = vector.broadcast %143 : vector<8x1xf32> to vector<8x512xf32>
    %149 = arith.mulf %148, %147 : vector<8x512xf32>
    %150 = arith.addf %139, %149 : vector<8x512xf32>
    %c503_i32 = arith.constant 503 : i32
    %151 = tpu.dynamic_rotate %88 by %c503_i32 dim 1 : vector<8x512xf32>, i32 -> vector<8x512xf32>
    %c119_i32 = arith.constant 119 : i32
    %152 = vector.broadcast %c119_i32 : i32 to vector<1x512xi32>
    %153 = arith.cmpi slt, %3, %152 : vector<1x512xi32>
    %154 = vector.extract_strided_slice %89 {offsets = [0, 6], sizes = [8, 1], strides = [1, 1]} : vector<8x7xf32> to vector<8x1xf32>
    %155 = arith.extui %153 : vector<1x512xi1> to vector<1x512xi32>
    %156 = arith.sitofp %155 : vector<1x512xi32> to vector<1x512xf32>
    %157 = vector.broadcast %156 : vector<1x512xf32> to vector<8x512xf32>
    %158 = arith.mulf %151, %157 : vector<8x512xf32>
    %159 = vector.broadcast %154 : vector<8x1xf32> to vector<8x512xf32>
    %160 = arith.mulf %159, %158 : vector<8x512xf32>
    %161 = arith.addf %150, %160 : vector<8x512xf32>
    %c0_28 = arith.constant 0 : index
    %c0_29 = arith.constant 0 : index
    %162 = vector.load %arg8[%c0_28, %c0_29] : memref<8x8xf32, #tpu.memory_space<vmem>>, vector<8x8xf32>
    %cst_30 = arith.constant dense<0.000000e+00> : vector<8x512xf32>
    %163 = tpu.matmul %162, %161, %cst_30 {dimension_numbers = #tpu.dot_dimension_numbers<[1], [0], [0], [1], [0, 0, 1, 1], [], []>} : vector<8x8xf32>, vector<8x512xf32>, vector<8x512xf32> -> vector<8x512xf32>
    %c0_31 = arith.constant 0 : index
    %c0_32 = arith.constant 0 : index
    %164 = vector.load %arg9[%c0_31, %c0_32] : memref<8x1xf32, #tpu.memory_space<vmem>>, vector<8x1xf32>
    %165 = vector.broadcast %164 : vector<8x1xf32> to vector<8x512xf32>
    %166 = arith.addf %163, %165 : vector<8x512xf32>
    %167 = arith.mulf %37, %166 : vector<8x512xf32>
    %c0_33 = arith.constant 0 : index
    %c0_34 = arith.constant 0 : index
    %168 = vector.load %arg10[%c0_33, %c0_34] : memref<8x8xf32, #tpu.memory_space<vmem>>, vector<8x8xf32>
    %cst_35 = arith.constant dense<0.000000e+00> : vector<8x512xf32>
    %169 = tpu.matmul %168, %167, %cst_35 {dimension_numbers = #tpu.dot_dimension_numbers<[1], [0], [0], [1], [0, 0, 1, 1], [], []>} : vector<8x8xf32>, vector<8x512xf32>, vector<8x512xf32> -> vector<8x512xf32>
    %c0_36 = arith.constant 0 : index
    %c0_37 = arith.constant 0 : index
    %170 = vector.load %arg11[%c0_36, %c0_37] : memref<8x1xf32, #tpu.memory_space<vmem>>, vector<8x1xf32>
    %171 = vector.broadcast %170 : vector<8x1xf32> to vector<8x512xf32>
    %172 = arith.addf %169, %171 : vector<8x512xf32>
    %173 = arith.addf %172, %0 : vector<8x512xf32>
    %c0_38 = arith.constant 0 : index
    %c0_39 = arith.constant 0 : index
    %174 = vector.load %arg12[%c0_38, %c0_39] : memref<8x512xf32, #tpu.memory_space<vmem>>, vector<8x512xf32>
    tpu.vector_store %arg12[%c0_38, %c0_39], %173 {strides = array<i32>} : memref<8x512xf32, #tpu.memory_space<vmem>>, vector<8x512xf32>,
    return
  }
  func.func @transform_0(%arg0: i32) -> (i32, i32) {
    %c0_i32 = arith.constant 0 : i32
    %c0_i32_0 = arith.constant 0 : i32
    return %c0_i32, %arg0 : i32, i32
  }
  func.func @transform_1(%arg0: i32) -> (i32, i32) {
    %c0_i32 = arith.constant 0 : i32
    %c0_i32_0 = arith.constant 0 : i32
    %c0_i32_1 = arith.constant 0 : i32
    return %c0_i32, %c0_i32_0 : i32, i32
  }
  func.func @transform_2(%arg0: i32) -> (i32, i32) {
    %c0_i32 = arith.constant 0 : i32
    %c0_i32_0 = arith.constant 0 : i32
    %c0_i32_1 = arith.constant 0 : i32
    return %c0_i32, %c0_i32_0 : i32, i32
  }
  func.func @transform_3(%arg0: i32) -> (i32, i32) {
    %c0_i32 = arith.constant 0 : i32
    %c0_i32_0 = arith.constant 0 : i32
    %c0_i32_1 = arith.constant 0 : i32
    return %c0_i32, %c0_i32_0 : i32, i32
  }
  func.func @transform_4(%arg0: i32) -> (i32, i32) {
    %c0_i32 = arith.constant 0 : i32
    %c0_i32_0 = arith.constant 0 : i32
    %c0_i32_1 = arith.constant 0 : i32
    return %c0_i32, %c0_i32_0 : i32, i32
  }
  func.func @transform_5(%arg0: i32) -> (i32, i32) {
    %c0_i32 = arith.constant 0 : i32
    %c0_i32_0 = arith.constant 0 : i32
    %c0_i32_1 = arith.constant 0 : i32
    return %c0_i32, %c0_i32_0 : i32, i32
  }
  func.func @transform_6(%arg0: i32) -> (i32, i32) {
    %c0_i32 = arith.constant 0 : i32
    %c0_i32_0 = arith.constant 0 : i32
    %c0_i32_1 = arith.constant 0 : i32
    return %c0_i32, %c0_i32_0 : i32, i32
  }
  func.func @transform_7(%arg0: i32) -> (i32, i32) {
    %c0_i32 = arith.constant 0 : i32
    %c0_i32_0 = arith.constant 0 : i32
    %c0_i32_1 = arith.constant 0 : i32
    return %c0_i32, %c0_i32_0 : i32, i32
  }
  func.func @transform_8(%arg0: i32) -> (i32, i32) {
    %c0_i32 = arith.constant 0 : i32
    %c0_i32_0 = arith.constant 0 : i32
    %c0_i32_1 = arith.constant 0 : i32
    return %c0_i32, %c0_i32_0 : i32, i32
  }
  func.func @transform_9(%arg0: i32) -> (i32, i32) {
    %c0_i32 = arith.constant 0 : i32
    %c0_i32_0 = arith.constant 0 : i32
    %c0_i32_1 = arith.constant 0 : i32
    return %c0_i32, %c0_i32_0 : i32, i32
  }
  func.func @transform_10(%arg0: i32) -> (i32, i32) {
    %c0_i32 = arith.constant 0 : i32
    %c0_i32_0 = arith.constant 0 : i32
    %c0_i32_1 = arith.constant 0 : i32
    return %c0_i32, %c0_i32_0 : i32, i32
  }
  func.func @transform_11(%arg0: i32) -> (i32, i32) {
    %c0_i32 = arith.constant 0 : i32
    %c0_i32_0 = arith.constant 0 : i32
    return %c0_i32, %arg0 : i32, i32
  }
}

</mosaic_0001>

<bundles_post_ra>
// kernel: attention_forward.1
= control target key start
LH: loop header
LB: loop body
LE: loop exit
PB: predicated region body
PF: predicated region fallthrough
CT: control target
= control target key end

     0   :  { %16 = vsyncpa [#allocation3], 0  ;;  %s2271_s0 = inlined_call_operand.hbm [shape: f32[8,512], index: 0, kind: input, shape index: {}]   ;;  %s2272_s1 = inlined_call_operand.hbm [shape: f32[8,8], index: 1, kind: input, shape index: {}]   ;;  %s2273_s2 = inlined_call_operand.hbm [shape: f32[8,1], index: 2, kind: input, shape index: {}]   ;;  %s2274_s3 = inlined_call_operand.hbm [shape: f32[8,5], index: 3, kind: input, shape index: {}]   ;;  %s2275_s4 = inlined_call_operand.hbm [shape: f32[8,1], index: 4, kind: input, shape index: {}]   ;;  %s2276_s5 = inlined_call_operand.hbm [shape: f32[8,7], index: 5, kind: input, shape index: {}]   ;;  %s2277_s6 = inlined_call_operand.hbm [shape: f32[8,1], index: 6, kind: input, shape index: {}]   ;;  %s2278_s7 = inlined_call_operand.hbm [shape: f32[8,8], index: 7, kind: input, shape index: {}]   ;;  %s2279_s8 = inlined_call_operand.hbm [shape: f32[8,1], index: 8, kind: input, shape index: {}]   ;;  %s2280_s9 = inlined_call_operand.hbm [shape: f32[8,8], index: 9, kind: input, shape index: {}]   ;;  %s2281_s10 = inlined_call_operand.hbm [shape: f32[8,1], index: 10, kind: input, shape index: {}]   ;;  %s2282_s11 = inlined_call_operand.hbm [shape: f32[8,512], index: 11, kind: output, shape index: {}]  }
   0x1   :  { %17 = vsyncpa [#allocation6], 0 }
   0x2   :  { %18 = vsyncpa [#allocation9], 0 }
   0x3   :  { %19 = vsyncpa [#allocation12], 0 }
   0x4   :  { %20 = vsyncpa [#allocation15], 0 }
   0x5   :  { %21 = vsyncpa [#allocation18], 0 }
   0x6   :  { %22 = vsyncpa [#allocation4], 0  ;;  %s1589_s17 = smov [#allocation5]   ;;  %s1590_s19 = smov [#allocation8]  }
   0x7   :  { %s39_s18 = sshll.u32 %s1589_s17, 4  ;;  %s59_s20 = sshll.u32 %s1590_s19, 4  ;;  %s40_s18 = int_to_ptr.vmem [resolvable:$true] %s39_s18  ;;  %s60_s20 = int_to_ptr.vmem [resolvable:$true] %s59_s20 }
   0x8   :  { %s1311_s23 = scalar_lea.hbm %s2272_s1, 128 }
   0x9   :  { %p1312_p0 = scmp.ne.s32.totalorder %s2272_s1, %s1311_s23  ;;  %p1315_p1 = scmp.lt.u32.totalorder %s1311_s23, %s2272_s1 }
   0xb   :  { %p1317_p2 = pnand %p1315_p1, %p1312_p0 }
   0xd   :  { %1320 = shalt.err (!%p1317_p2)
}
   0xe   :  { %s1321_s28 = scalar_lea.vmem %s40_s18, 128  ;;  %p1326_p4 = scmp.lt.s32.totalorder %s40_s18, %s40_s18 }
   0xf   :  { %p1322_p3 = scmp.ne.s32.totalorder %s40_s18, %s1321_s28  ;;  %p1327_p5 = scmp.lt.s32.totalorder %s1321_s28, %s1321_s28 }
  0x11   :  { %p1328_p6 = por %p1327_p5, %p1326_p4 }
  0x13   :  { %p1329_p7 = pnand %p1328_p6, %p1322_p3 }
  0x15   :  { %1332 = shalt.err (!%p1329_p7)
}
  0x16   :  { %42 = dma.hbm_to_vmem [thread:$0]  %s2272_s1, 128, %s40_s18, [#allocation6]  }
  0x17   :  { %s1333_s14 = scalar_lea.hbm %s2274_s3, 128 }
  0x18   :  { %p1334_p8 = scmp.ne.s32.totalorder %s2274_s3, %s1333_s14  ;;  %p1337_p9 = scmp.lt.u32.totalorder %s1333_s14, %s2274_s3 }
  0x1a   :  { %p1339_p10 = pnand %p1337_p9, %p1334_p8 }
  0x1c   :  { %1342 = shalt.err (!%p1339_p10)
}
  0x1d   :  { %s1343_s21 = scalar_lea.vmem %s60_s20, 128  ;;  %p1348_p12 = scmp.lt.s32.totalorder %s60_s20, %s60_s20 }
  0x1e   :  { %p1344_p11 = scmp.ne.s32.totalorder %s60_s20, %s1343_s21  ;;  %p1349_p13 = scmp.lt.s32.totalorder %s1343_s21, %s1343_s21 }
  0x20   :  { %p1350_p0 = por %p1349_p13, %p1348_p12 }
  0x22   :  { %p1351_p1 = pnand %p1350_p0, %p1344_p11 }
  0x24   :  { %1354 = shalt.err (!%p1351_p1)
}
  0x25   :  { %62 = dma.hbm_to_vmem [thread:$0]  %s2274_s3, 128, %s60_s20, [#allocation9]  }
  0x26   :  { %s1591_s22 = smov [#allocation11]   ;;  %s1592_s24 = smov [#allocation14]  }
  0x27   :  { %s79_s23 = sshll.u32 %s1591_s22, 4  ;;  %s99_s25 = sshll.u32 %s1592_s24, 4  ;;  %s80_s23 = int_to_ptr.vmem [resolvable:$true] %s79_s23  ;;  %s100_s25 = int_to_ptr.vmem [resolvable:$true] %s99_s25 }
  0x28   :  { %s1355_s28 = scalar_lea.hbm %s2276_s5, 128 }
  0x29   :  { %p1356_p2 = scmp.ne.s32.totalorder %s2276_s5, %s1355_s28  ;;  %p1359_p3 = scmp.lt.u32.totalorder %s1355_s28, %s2276_s5 }
  0x2b   :  { %p1361_p4 = pnand %p1359_p3, %p1356_p2 }
  0x2d   :  { %1364 = shalt.err (!%p1361_p4)
}
  0x2e   :  { %s1365_s3 = scalar_lea.vmem %s80_s23, 128  ;;  %p1370_p6 = scmp.lt.s32.totalorder %s80_s23, %s80_s23 }
  0x2f   :  { %p1366_p5 = scmp.ne.s32.totalorder %s80_s23, %s1365_s3  ;;  %p1371_p7 = scmp.lt.s32.totalorder %s1365_s3, %s1365_s3 }
  0x31   :  { %p1372_p8 = por %p1371_p7, %p1370_p6 }
  0x33   :  { %p1373_p9 = pnand %p1372_p8, %p1366_p5 }
  0x35   :  { %1376 = shalt.err (!%p1373_p9)
}
  0x36   :  { %82 = dma.hbm_to_vmem [thread:$0]  %s2276_s5, 128, %s80_s23, [#allocation12]  }
  0x37   :  { %s1377_s17 = scalar_lea.hbm %s2278_s7, 128 }
  0x38   :  { %p1378_p10 = scmp.ne.s32.totalorder %s2278_s7, %s1377_s17  ;;  %p1381_p11 = scmp.lt.u32.totalorder %s1377_s17, %s2278_s7 }
  0x3a   :  { %p1383_p12 = pnand %p1381_p11, %p1378_p10 }
  0x3c   :  { %1386 = shalt.err (!%p1383_p12)
}
  0x3d   :  { %s1387_s22 = scalar_lea.vmem %s100_s25, 128  ;;  %p1392_p0 = scmp.lt.s32.totalorder %s100_s25, %s100_s25 }
  0x3e   :  { %p1388_p13 = scmp.ne.s32.totalorder %s100_s25, %s1387_s22  ;;  %p1393_p1 = scmp.lt.s32.totalorder %s1387_s22, %s1387_s22 }
  0x40   :  { %p1394_p2 = por %p1393_p1, %p1392_p0 }
  0x42   :  { %p1395_p3 = pnand %p1394_p2, %p1388_p13 }
  0x44   :  { %1398 = shalt.err (!%p1395_p3)
}
  0x45   :  { %102 = dma.hbm_to_vmem [thread:$0]  %s2278_s7, 128, %s100_s25, [#allocation15]  }
  0x46   :  { %s1593_s24 = smov [#allocation17]   ;;  %s1594_s27 = smov [#allocation2]  }
  0x47   :  { %s119_s26 = sshll.u32 %s1593_s24, 4  ;;  %s29_s28 = sshll.u32 %s1594_s27, 4  ;;  %s120_s26 = int_to_ptr.vmem [resolvable:$true] %s119_s26  ;;  %s30_s28 = int_to_ptr.vmem [resolvable:$true] %s29_s28 }
  0x48   :  { %s1399_s12 = scalar_lea.hbm %s2280_s9, 128 }
  0x49   :  { %p1400_p4 = scmp.ne.s32.totalorder %s2280_s9, %s1399_s12  ;;  %p1403_p5 = scmp.lt.u32.totalorder %s1399_s12, %s2280_s9 }
  0x4b   :  { %p1405_p6 = pnand %p1403_p5, %p1400_p4 }
  0x4d   :  { %1408 = shalt.err (!%p1405_p6)
}
  0x4e   :  { %s1409_s7 = scalar_lea.vmem %s120_s26, 128  ;;  %p1414_p8 = scmp.lt.s32.totalorder %s120_s26, %s120_s26 }
  0x4f   :  { %p1410_p7 = scmp.ne.s32.totalorder %s120_s26, %s1409_s7  ;;  %p1415_p9 = scmp.lt.s32.totalorder %s1409_s7, %s1409_s7 }
  0x51   :  { %p1416_p10 = por %p1415_p9, %p1414_p8 }
  0x53   :  { %p1417_p11 = pnand %p1416_p10, %p1410_p7 }
  0x55   :  { %1420 = shalt.err (!%p1417_p11)
}
  0x56   :  { %122 = dma.hbm_to_vmem [thread:$0]  %s2280_s9, 128, %s120_s26, [#allocation18]  }
  0x57   :  { %s1421_s19 = scalar_lea.hbm %s2271_s0, 512 }
  0x58   :  { %p1422_p12 = scmp.ne.s32.totalorder %s2271_s0, %s1421_s19  ;;  %p1425_p13 = scmp.lt.u32.totalorder %s1421_s19, %s2271_s0 }
  0x5a   :  { %p1427_p0 = pnand %p1425_p13, %p1422_p12 }
  0x5c   :  { %1430 = shalt.err (!%p1427_p0)
}
  0x5d   :  { %s1431_s5 = scalar_lea.vmem %s30_s28, 512  ;;  %p1436_p2 = scmp.lt.s32.totalorder %s30_s28, %s30_s28 }
  0x5e   :  { %p1432_p1 = scmp.ne.s32.totalorder %s30_s28, %s1431_s5  ;;  %p1437_p3 = scmp.lt.s32.totalorder %s1431_s5, %s1431_s5 }
  0x60   :  { %p1438_p4 = por %p1437_p3, %p1436_p2 }
  0x62   :  { %p1439_p5 = pnand %p1438_p4, %p1432_p1 }
  0x64   :  { %1442 = shalt.err (!%p1439_p5)
}
  0x65   :  { %32 = dma.hbm_to_vmem [thread:$0]  %s2271_s0, 512, %s30_s28, [#allocation3]  }
  0x66   :  { %s1595_s24 = smov [#allocation7]   ;;  %s1596_s27 = smov [#allocation10]  }
  0x67   :  { %s49_s26 = sshll.u32 %s1595_s24, 4  ;;  %s69_s29 = sshll.u32 %s1596_s27, 4  ;;  %s50_s26 = int_to_ptr.vmem [resolvable:$true] %s49_s26  ;;  %s70_s29 = int_to_ptr.vmem [resolvable:$true] %s69_s29 }
  0x68   :  { %s1443_s13 = scalar_lea.hbm %s2273_s2, 128 }
  0x69   :  { %p1444_p6 = scmp.ne.s32.totalorder %s2273_s2, %s1443_s13  ;;  %p1447_p7 = scmp.lt.u32.totalorder %s1443_s13, %s2273_s2 }
  0x6b   :  { %p1449_p8 = pnand %p1447_p7, %p1444_p6 }
  0x6d   :  { %1452 = shalt.err (!%p1449_p8)
}
  0x6e   :  { %s1453_s0 = scalar_lea.vmem %s50_s26, 128  ;;  %p1458_p10 = scmp.lt.s32.totalorder %s50_s26, %s50_s26 }
  0x6f   :  { %p1454_p9 = scmp.ne.s32.totalorder %s50_s26, %s1453_s0  ;;  %p1459_p11 = scmp.lt.s32.totalorder %s1453_s0, %s1453_s0 }
  0x71   :  { %p1460_p12 = por %p1459_p11, %p1458_p10 }
  0x73   :  { %p1461_p13 = pnand %p1460_p12, %p1454_p9 }
  0x75   :  { %1464 = shalt.err (!%p1461_p13)
}
  0x76   :  { %52 = dma.hbm_to_vmem [thread:$0]  %s2273_s2, 128, %s50_s26, [#allocation6]  }
  0x77   :  { %s1465_s17 = scalar_lea.hbm %s2275_s4, 128 }
  0x78   :  { %p1466_p0 = scmp.ne.s32.totalorder %s2275_s4, %s1465_s17  ;;  %p1469_p1 = scmp.lt.u32.totalorder %s1465_s17, %s2275_s4 }
  0x7a   :  { %p1471_p2 = pnand %p1469_p1, %p1466_p0 }
  0x7c   :  { %1474 = shalt.err (!%p1471_p2)
}
  0x7d   :  { %s1475_s22 = scalar_lea.vmem %s70_s29, 128  ;;  %p1480_p4 = scmp.lt.s32.totalorder %s70_s29, %s70_s29 }
  0x7e   :  { %p1476_p3 = scmp.ne.s32.totalorder %s70_s29, %s1475_s22  ;;  %p1481_p5 = scmp.lt.s32.totalorder %s1475_s22, %s1475_s22 }
  0x80   :  { %p1482_p6 = por %p1481_p5, %p1480_p4 }
  0x82   :  { %p1483_p7 = pnand %p1482_p6, %p1476_p3 }
  0x84   :  { %1486 = shalt.err (!%p1483_p7)
}
  0x85   :  { %72 = dma.hbm_to_vmem [thread:$0]  %s2275_s4, 128, %s70_s29, [#allocation9]  }
  0x86   :  { %s1597_s9 = smov [#allocation13]   ;;  %s1598_s24 = smov [#allocation16]  }
  0x87   :  { %s89_s23 = sshll.u32 %s1597_s9, 4  ;;  %s109_s26 = sshll.u32 %s1598_s24, 4  ;;  %s90_s23 = int_to_ptr.vmem [resolvable:$true] %s89_s23  ;;  %s110_s26 = int_to_ptr.vmem [resolvable:$true] %s109_s26 }
  0x88   :  { %s1487_s12 = scalar_lea.hbm %s2277_s6, 128 }
  0x89   :  { %p1488_p8 = scmp.ne.s32.totalorder %s2277_s6, %s1487_s12  ;;  %p1491_p9 = scmp.lt.u32.totalorder %s1487_s12, %s2277_s6 }
  0x8b   :  { %p1493_p10 = pnand %p1491_p9, %p1488_p8 }
  0x8d   :  { %1496 = shalt.err (!%p1493_p10)
}
  0x8e   :  { %s1497_s4 = scalar_lea.vmem %s90_s23, 128  ;;  %p1502_p12 = scmp.lt.s32.totalorder %s90_s23, %s90_s23 }
  0x8f   :  { %p1498_p11 = scmp.ne.s32.totalorder %s90_s23, %s1497_s4  ;;  %p1503_p13 = scmp.lt.s32.totalorder %s1497_s4, %s1497_s4 }
  0x91   :  { %p1504_p0 = por %p1503_p13, %p1502_p12 }
  0x93   :  { %p1505_p1 = pnand %p1504_p0, %p1498_p11 }
  0x95   :  { %1508 = shalt.err (!%p1505_p1)
}
  0x96   :  { %92 = dma.hbm_to_vmem [thread:$0]  %s2277_s6, 128, %s90_s23, [#allocation12]  }
  0x97   :  { %s1509_s25 = scalar_lea.hbm %s2279_s8, 128 }
  0x98   :  { %p1510_p2 = scmp.ne.s32.totalorder %s2279_s8, %s1509_s25  ;;  %p1513_p3 = scmp.lt.u32.totalorder %s1509_s25, %s2279_s8 }
  0x9a   :  { %p1515_p4 = pnand %p1513_p3, %p1510_p2 }
  0x9c   :  { %1518 = shalt.err (!%p1515_p4)
}
  0x9d   :  { %s1519_s21 = scalar_lea.vmem %s110_s26, 128  ;;  %p1524_p6 = scmp.lt.s32.totalorder %s110_s26, %s110_s26 }
  0x9e   :  { %p1520_p5 = scmp.ne.s32.totalorder %s110_s26, %s1519_s21  ;;  %p1525_p7 = scmp.lt.s32.totalorder %s1519_s21, %s1519_s21 }
  0xa0   :  { %p1526_p8 = por %p1525_p7, %p1524_p6 }
  0xa2   :  { %p1527_p9 = pnand %p1526_p8, %p1520_p5 }
  0xa4   :  { %1530 = shalt.err (!%p1527_p9)
}
  0xa5   :  { %112 = dma.hbm_to_vmem [thread:$0]  %s2279_s8, 128, %s110_s26, [#allocation15]  }
  0xa6   :  { %s1599_s18 = smov [#allocation19]   ;;  %s1531_s9 = scalar_lea.hbm %s2281_s10, 128 }
  0xa7   :  { %s129_s22 = sshll.u32 %s1599_s18, 4  ;;  %p1532_p10 = scmp.ne.s32.totalorder %s2281_s10, %s1531_s9  ;;  %s130_s22 = int_to_ptr.vmem [resolvable:$true] %s129_s22 }
  0xa8   :  { %p1535_p11 = scmp.lt.u32.totalorder %s1531_s9, %s2281_s10 }
  0xaa   :  { %p1537_p12 = pnand %p1535_p11, %p1532_p10 }
  0xac   :  { %1540 = shalt.err (!%p1537_p12)
}
  0xad   :  { %s1541_s12 = scalar_lea.vmem %s130_s22, 128  ;;  %p1546_p0 = scmp.lt.s32.totalorder %s130_s22, %s130_s22 }
  0xae   :  { %p1542_p13 = scmp.ne.s32.totalorder %s130_s22, %s1541_s12  ;;  %p1547_p1 = scmp.lt.s32.totalorder %s1541_s12, %s1541_s12 }
  0xb0   :  { %p1548_p2 = por %p1547_p1, %p1546_p0 }
  0xb2   :  { %p1549_p3 = pnand %p1548_p2, %p1542_p13 }
  0xb4   :  { %1552 = shalt.err (!%p1549_p3)
}
  0xb5   :  { %132 = dma.hbm_to_vmem [thread:$0]  %s2281_s10, 128, %s130_s22, [#allocation18]  }
  0xb6   :  { %1575 = dma.done.wait [#allocation3], 512  }
  0xb7   :  { %1576 = vsyncadd [#allocation3], 4294966784 }
  0xb8   :  { %1577 = dma.done.wait [#allocation6], 256  }
  0xb9   :  { %1578 = vsyncadd [#allocation6], 4294967040 }
  0xba   :  { %1579 = dma.done.wait [#allocation9], 256  }
  0xbb   :  { %1580 = vsyncadd [#allocation9], 4294967040 }
  0xbc   :  { %1581 = dma.done.wait [#allocation12], 256  }
  0xbd   :  { %1582 = vsyncadd [#allocation12], 4294967040 }
  0xbe   :  { %1583 = dma.done.wait [#allocation15], 256  }
  0xbf   :  { %1584 = vsyncadd [#allocation15], 4294967040 }
  0xc0   :  { %1585 = dma.done.wait [#allocation18], 256  }
  0xc1   :  { %1586 = vsyncadd [#allocation18], 4294967040  ;;  %v1600_v0 = vmov 0.0   ;;  %v1601_v1 = vmov 0   ;;  %v167_v2 = vld [vmem:[#allocation2 + $0x8] sm:$0xff]  ;;  %v169_v3 = vld [vmem:[#allocation2 + $0x18] sm:$0xff] }
  0xc2   :  { %254 = vmatprep.mubr.f32.mxu0 %v1600_v0  ;;  %325 = vmatprep.mubr.f32.mxu1 %v1600_v0  ;;  %v166_v4 = vld [vmem:[#allocation2] sm:$0xff]  ;;  %vm186_vm0 = vcmask 64512   ;;  %v168_v5 = vld [vmem:[#allocation2 + $0x10] sm:$0xff]  ;;  %v180_v7 = vld [vmem:[#allocation7] sm:$0xff]  ;;  %v1602_v10 = vmov 2   ;;  %v1603_v11 = vmov 4  }
  0xc3   :  { %1278 = vset.pattern.permute.xlu0 %v1601_v1  ;;  %1280 = vset.pattern.permute.xlu1 %v1601_v1  ;;  %v179_v6 = vld [vmem:[#allocation5] sm:$0xff]  ;;  %v426_v8 = vld [vmem:[#allocation10] sm:$0xff]  ;;  %v416_v9 = vld [vmem:[#allocation8] sm:$0xff]  ;;  %v1604_v12 = vmov 1   ;;  %v1605_v13 = vmov 3   ;;  %s1606_s10 = smov 1  }
  0xc4   :  { %190 = vmatprep.subr.mxu0 %v167_v2  ;;  %261 = vmatprep.subr.mxu1 %v169_v3  ;;  %s1607_s13 = smov 2   ;;  %s1608_s3 = smov 127  }
  0xc5   :  { %191 = vmatpush1.msra.mxu0 %v166_v4  ;;  %262 = vmatpush1.msra.mxu1 %v168_v5  ;;  %s1609_s20 = smov 126   ;;  %s1612_s14 = smov 9  }
  0xc6   :  { %1202 = vmatmul.mubr.msk.f32.vlgmr.msra.gmra.mrb[0].mxu0 %vm186_vm0, %v179_v6  ;;  %1203 = vmatmul.mubr.msk.f32.vlgmr.msra.gmra.mrb[0].mxu1 %vm186_vm0, %v179_v6  ;;  %s1613_s4 = smov 6   ;;  %s1614_s29 = smov 3  }
  0xc7   :  { %183 = vperm.xlu0 %1278, %v180_v7   ;;  %429 = vperm.xlu1 %1280, %v426_v8   ;;  %s1615_s7 = smov 125   ;;  %s1616_s0 = smov 122  }
  0xc8   :  { %940 = vmatprep.mubr.f32.mxu0 %v1600_v0  ;;  %1011 = vmatprep.mubr.f32.mxu1 %v1600_v0  ;;  %s1617_s28 = smov 119   ;;  %s1618_s25 = smov [#allocation20]  }
  0xc9   :  { %s1188_s15 = sshll.u32 %s1618_s25, 4  ;;  %s1189_s15 = int_to_ptr.vmem [resolvable:$true] %s1188_s15 }
  0xca   :  { %s1553_s16 = scalar_lea.vmem %s1189_s15, 512  ;;  %p1558_p5 = scmp.lt.s32.totalorder %s1189_s15, %s1189_s15 }
  0xcb   :  { %1279 = vset.pattern.permute.xlu0 %v1602_v10  ;;  %466 = vperm.xlu1 %1280, %v416_v9   ;;  %p1554_p4 = scmp.ne.s32.totalorder %s1189_s15, %s1553_s16  ;;  %p1559_p6 = scmp.lt.s32.totalorder %s1553_s16, %s1553_s16 }
  0xcc   :  { %419 = vperm.xlu0 %1279, %v416_v9  }
  0xcd   :  { %p1560_p7 = por %p1559_p6, %p1558_p5 }
  0xcf   :  { %1281 = vset.pattern.permute.xlu1 %v1604_v12  ;;  %p1561_p8 = pnand %p1560_p7, %p1554_p4 }
  0xd0   :  { %1282 = vset.pattern.permute.xlu0 %v1603_v11  ;;  %507 = vperm.xlu1 %1281, %v416_v9  }
  0xd1   :  { %589 = vperm.xlu0 %1282, %v416_v9  }
  0xd4   :  { %1284 = vset.pattern.permute.xlu1 %v1601_v1 }
  0xd5   :  { %1283 = vset.pattern.permute.xlu0 %v1605_v13 }
  0xd6   :  { %548 = vperm.xlu0 %1283, %v416_v9  }
 0x146   :  { %v184_v14 = vpop.permute.xlu0 %183 }
 0x199   :  { %v256_v15 = vpop.f32.mrb[0].mxu0  ;;  %v327_v16 = vpop.f32.mrb[0].mxu1 }
 0x19a   :  { %v1823_v17 = vadd.f32 %v256_v15, %v184_v14  ;;  %v1825_v18 = vadd.f32 %v327_v16, %v184_v14  ;;  %v258_v19 = vpop.f32.mrb[1].mxu0  ;;  %v329_v20 = vpop.f32.mrb[1].mxu1 }
 0x19b   :  { %v1827_v21 = vadd.f32 %v258_v19, %v184_v14  ;;  %v1829_v22 = vadd.f32 %v329_v20, %v184_v14 }
 0x19c   :  { %v332_v23 = vand.u32 2147483647, %v1823_v17  ;;  %v334_v24 = vand.u32 2147483647, %v1825_v18  ;;  %v392_v35 = vmul.f32 -0.5, %v1823_v17  ;;  %v394_v37 = vmul.f32 -0.5, %v1825_v18 }
 0x19d   :  { %v333_v25 = vand.u32 2147483647, %v1827_v21  ;;  %v335_v29 = vand.u32 2147483647, %v1829_v22  ;;  %v393_v45 = vmul.f32 -0.5, %v1827_v21  ;;  %v395_v57 = vmul.f32 -0.5, %v1829_v22 }
 0x19e   :  { %v336_v26 = vmul.f32 0.23164189, %v332_v23  ;;  %v338_v27 = vmul.f32 0.23164189, %v334_v24  ;;  %v396_v40 = vmul.f32 %v392_v35, %v1823_v17  ;;  %v398_v44 = vmul.f32 %v394_v37, %v1825_v18 }
 0x19f   :  { %v337_v28 = vmul.f32 0.23164189, %v333_v25  ;;  %v339_v32 = vmul.f32 0.23164189, %v335_v29  ;;  %v397_v56 = vmul.f32 %v393_v45, %v1827_v21  ;;  %v399_v5 = vmul.f32 %v395_v57, %v1829_v22 }
 0x1a0   :  { %v340_v30 = vadd.f32 1.0, %v336_v26  ;;  %v342_v31 = vadd.f32 1.0, %v338_v27  ;;  %v400_v50 = vmul.f32 1.442695, %v396_v40  ;;  %v404_v55 = vmul.f32 1.442695, %v398_v44 }
 0x1a1   :  { %v341_v33 = vadd.f32 1.0, %v337_v28  ;;  %v343_v34 = vadd.f32 1.0, %v339_v32  ;;  %v402_v4 = vmul.f32 1.442695, %v397_v56  ;;  %v406_v19 = vmul.f32 1.442695, %v399_v5 }
 0x1a2   :  { %1291 = vrcp.f32 %v340_v30  ;;  %v384_v35 = vmax.f32 %v1823_v17, 0.0  ;;  %v386_v17 = vmax.f32 %v1825_v18, 0.0 }
 0x1a3   :  { %1293 = vrcp.f32 %v342_v31 }
 0x1a4   :  { %1295 = vrcp.f32 %v341_v33 }
 0x1a5   :  { %1297 = vrcp.f32 %v343_v34 }
 0x1a6   :  { %1299 = vpow2.f32 %v400_v50  ;;  %v1610_v50 = vmov 5  }
 0x1a7   :  { %1301 = vpow2.f32 %v404_v55  ;;  %v170_v55 = vlaneseq }
 0x1a8   :  { %1303 = vpow2.f32 %v402_v4 }
 0x1a9   :  { %1305 = vpow2.f32 %v406_v19 }
 0x1ac   :  { %v1292_v36 = vpop.eup %1291 }
 0x1ad   :  { %v348_v38 = vmul.f32 0.5307027, %v1292_v36  ;;  %v1294_v39 = vpop.eup %1293 }
 0x1ae   :  { %v350_v42 = vmul.f32 0.5307027, %v1294_v39  ;;  %v1296_v43 = vpop.eup %1295 }
 0x1af   :  { %v352_v41 = vadd.f32 -0.72657603, %v348_v38  ;;  %v349_v48 = vmul.f32 0.5307027, %v1296_v43  ;;  %v1298_v49 = vpop.eup %1297 }
 0x1b0   :  { %v354_v47 = vadd.f32 -0.72657603, %v350_v42  ;;  %v351_v54 = vmul.f32 0.5307027, %v1298_v49  ;;  %v1300_v34 = vpop.eup %1299 }
 0x1b1   :  { %v356_v46 = vmul.f32 %v1292_v36, %v352_v41  ;;  %v353_v53 = vadd.f32 -0.72657603, %v349_v48 }
 0x1b2   :  { %v358_v52 = vmul.f32 %v1294_v39, %v354_v47  ;;  %v355_v61 = vadd.f32 -0.72657603, %v351_v54  ;;  %v385_v47 = vmax.f32 %v1827_v21, 0.0  ;;  %v600_v21 = vld [vmem:[#allocation11] sm:$0xff] }
 0x1b3   :  { %v360_v51 = vadd.f32 0.7107069, %v356_v46  ;;  %v357_v60 = vmul.f32 %v1296_v43, %v353_v53 }
 0x1b4   :  { %v362_v59 = vadd.f32 0.7107069, %v358_v52  ;;  %v359_v3 = vmul.f32 %v1298_v49, %v355_v61  ;;  %v430_v52 = vpop.permute.xlu1 %429 }
 0x1b5   :  { %v364_v58 = vmul.f32 %v1292_v36, %v360_v51  ;;  %v361_v2 = vadd.f32 0.7107069, %v357_v60  ;;  %v1611_v51 = vmov 6  }
 0x1b6   :  { %v366_v63 = vmul.f32 %v1294_v39, %v362_v59  ;;  %v363_v9 = vadd.f32 0.7107069, %v359_v3 }
 0x1b7   :  { %v368_v62 = vadd.f32 -0.14224836, %v364_v58  ;;  %v365_v8 = vmul.f32 %v1296_v43, %v361_v2  ;;  %v1899_v58 = vand.u32 127, %v170_v55 }
 0x1b8   :  { %v370_v7 = vadd.f32 -0.14224836, %v366_v63  ;;  %v367_v16 = vmul.f32 %v1298_v49, %v363_v9 }
 0x1b9   :  { %v372_v6 = vmul.f32 %v1292_v36, %v368_v62  ;;  %v369_v15 = vadd.f32 -0.14224836, %v365_v8  ;;  %v172_v60 = vadd.s32 128, %v1899_v58  ;;  %v174_v63 = vadd.s32 384, %v1899_v58 }
 0x1ba   :  { %v374_v14 = vmul.f32 %v1294_v39, %v370_v7  ;;  %v371_v28 = vadd.f32 -0.14224836, %v367_v16  ;;  %vm449_vm3 = vcmp.ge.s32.totalorder %v1899_v58, 2  ;;  %vm444_vm4 = vcmp.lt.s32.totalorder %v1899_v58, 2 }
 0x1bb   :  { %v376_v13 = vadd.f32 0.1274148, %v372_v6  ;;  %v373_v27 = vmul.f32 %v1296_v43, %v369_v15  ;;  %v1906_v2 = vand.u32 127, %v172_v60  ;;  %v1910_v5 = vand.u32 127, %v174_v63 }
 0x1bc   :  { %v378_v26 = vadd.f32 0.1274148, %v374_v14  ;;  %v375_v33 = vmul.f32 %v1298_v49, %v371_v28  ;;  %vm485_vm8 = vcmp.lt.s32.totalorder %v1899_v58, 1  ;;  %vm490_vm9 = vcmp.ge.s32.totalorder %v1899_v58, 1 }
 0x1bd   :  { %v380_v20 = vmul.f32 %v1292_v36, %v376_v13  ;;  %v377_v32 = vadd.f32 0.1274148, %v373_v27  ;;  %v1302_v36 = vpop.eup %1301  ;;  %vm450_vm1 = vcmp.ge.s32.totalorder %v1906_v2, 2  ;;  %vm452_vm5 = vcmp.ge.s32.totalorder %v1910_v5, 2 }
 0x1be   :  { %v382_v31 = vmul.f32 %v1294_v39, %v378_v26  ;;  %v379_v41 = vadd.f32 0.1274148, %v375_v33  ;;  %v1304_v45 = vpop.eup %1303  ;;  %v1205_v14 = vsel %vm450_vm1, 1.0, %v1600_v0  ;;  %vm491_vm6 = vcmp.ge.s32.totalorder %v1906_v2, 1 }
 0x1bf   :  { %v388_v30 = vmul.f32 %v380_v20, %v332_v23  ;;  %v381_v40 = vmul.f32 %v1296_v43, %v377_v32  ;;  %v1204_v20 = vsel %vm449_vm3, 1.0, %v1600_v0  ;;  %v1209_v32 = vsel %vm491_vm6, 1.0, %v1600_v0 }
 0x1c0   :  { %v390_v38 = vmul.f32 %v382_v31, %v334_v24  ;;  %v383_v23 = vmul.f32 %v1298_v49, %v379_v41  ;;  %v387_v49 = vmax.f32 %v1829_v22, 0.0  ;;  %v610_v22 = vld [vmem:[#allocation13] sm:$0xff]  ;;  %vm493_vm10 = vcmp.ge.s32.totalorder %v1910_v5, 1 }
 0x1c1   :  { %v408_v37 = vmul.f32 %v1300_v34, %v388_v30  ;;  %v389_v44 = vmul.f32 %v381_v40, %v333_v25  ;;  %v1306_v25 = vpop.eup %1305  ;;  %v1207_v30 = vsel %vm452_vm5, 1.0, %v1600_v0  ;;  %vm526_vm11 = vcmp.lt.s32.totalorder %v1899_v58, 127 }
 0x1c2   :  { %v410_v39 = vmul.f32 %v1302_v36, %v390_v38  ;;  %v391_v43 = vmul.f32 %v383_v23, %v335_v29  ;;  %vm532_vm12 = vcmp.lt.s32.totalorder %v1906_v2, 127  ;;  %v1208_v38 = vsel %vm490_vm9, 1.0, %v1600_v0 }
 0x1c3   :  { %v1856_v42 = vsub.f32 %v384_v35, %v408_v37  ;;  %v409_v24 = vmul.f32 %v1304_v45, %v389_v44  ;;  %vm534_vm14 = vcmp.lt.s32.totalorder %v1910_v5, 127  ;;  %v1211_v36 = vsel %vm493_vm10, 1.0, %v1600_v0 }
 0x1c4   :  { %v1865_v46 = vsub.f32 %v386_v17, %v410_v39  ;;  %v411_v18 = vmul.f32 %v1306_v25, %v391_v43  ;;  %v1212_v45 = vsel %vm526_vm11, 1.0, %v1600_v0  ;;  %v1213_v17 = vsel %vm532_vm12, 1.0, %v1600_v0 }
 0x1c5   :  { %477 = vrot.lane.b32.xlu1 %v1856_v42, %s1606_s10  ;;  %436 = vrot.lane.b32.xlu0 %v1856_v42, %s1607_s13  ;;  %v1870_v48 = vsub.f32 %v385_v47, %v409_v24  ;;  %vm567_vm15 = vcmp.lt.s32.totalorder %v1899_v58, 126  ;;  %vm573_vm1 = vcmp.lt.s32.totalorder %v1906_v2, 126  ;;  %vm575_vm3 = vcmp.lt.s32.totalorder %v1910_v5, 126 }
 0x1c6   :  { %v1875_v29 = vsub.f32 %v387_v49, %v411_v18  ;;  %v1215_v18 = vsel %vm534_vm14, 1.0, %v1600_v0  ;;  %vm633_vm6 = vcmp.ge.s32.totalorder %v1899_v58, 9  ;;  %vm675_vm9 = vcmp.ge.s32.totalorder %v1906_v2, 6 }
 0x1c7   :  { %vm677_vm12 = vcmp.ge.s32.totalorder %v1910_v5, 6 }
 0x1c9   :  { %518 = vrot.lane.b32.xlu1 %v1856_v42, %s1608_s3  ;;  %440 = vrot.lane.b32.xlu0 %v1865_v46, %s1607_s13 }
 0x1cd   :  { %438 = vrot.lane.b32.xlu1 %v1870_v48, %s1607_s13  ;;  %481 = vrot.lane.b32.xlu0 %v1865_v46, %s1606_s10 }
 0x1d1   :  { %442 = vrot.lane.b32.xlu1 %v1875_v29, %s1607_s13  ;;  %522 = vrot.lane.b32.xlu0 %v1865_v46, %s1608_s3 }
 0x1d5   :  { %479 = vrot.lane.b32.xlu1 %v1870_v48, %s1606_s10  ;;  %559 = vrot.lane.b32.xlu0 %v1856_v42, %s1609_s20 }
 0x1d9   :  { %483 = vrot.lane.b32.xlu1 %v1875_v29, %s1606_s10  ;;  %563 = vrot.lane.b32.xlu0 %v1865_v46, %s1609_s20 }
 0x1dd   :  { %520 = vrot.lane.b32.xlu1 %v1870_v48, %s1608_s3  ;;  %603 = vperm.xlu0 %1283, %v600_v21  }
 0x1e1   :  { %524 = vrot.lane.b32.xlu1 %v1875_v29, %s1608_s3  ;;  %1285 = vset.pattern.permute.xlu0 %v1604_v12  ;;  %v420_v12 = vpop.permute.xlu0 %419 }
 0x1e2   :  { %691 = vperm.xlu0 %1285, %v600_v21   ;;  %v422_v6 = vmul.f32 %v420_v12, %v1856_v42  ;;  %v423_v8 = vmul.f32 %v420_v12, %v1870_v48  ;;  %v424_v9 = vmul.f32 %v420_v12, %v1865_v46  ;;  %v425_v16 = vmul.f32 %v420_v12, %v1875_v29 }
 0x1e4   :  { %v432_v19 = vadd.f32 %v430_v52, %v422_v6  ;;  %v433_v26 = vadd.f32 %v430_v52, %v423_v8  ;;  %v1928_v27 = vadd.f32 %v430_v52, %v424_v9  ;;  %v1942_v37 = vadd.f32 %v430_v52, %v425_v16 }
 0x1e5   :  { %561 = vrot.lane.b32.xlu1 %v1870_v48, %s1609_s20  ;;  %v1893_v53 = vpop.permute.xlu0 %589 }
 0x1e6   :  { %1286 = vset.pattern.permute.xlu0 %v1602_v10  ;;  %v1891_v10 = vpop.permute.xlu1 %466 }
 0x1e7   :  { %732 = vperm.xlu0 %1286, %v600_v21  }
 0x1e9   :  { %565 = vrot.lane.b32.xlu1 %v1875_v29, %s1609_s20 }
 0x1ea   :  { %v1895_v54 = vpop.permute.xlu1 %507 }
 0x1eb   :  { %1287 = vset.pattern.permute.xlu0 %v1603_v11  ;;  %v1897_v11 = vpop.permute.xlu0 %548 }
 0x1ec   :  { %773 = vperm.xlu0 %1287, %v600_v21  }
 0x1ed   :  { %613 = vperm.xlu1 %1284, %v610_v22  }
 0x1f0   :  { %1288 = vset.pattern.permute.xlu0 %v1610_v50 }
 0x1f1   :  { %650 = vperm.xlu1 %1284, %v600_v21   ;;  %814 = vperm.xlu0 %1288, %v600_v21  }
 0x1f5   :  { %1289 = vset.pattern.permute.xlu0 %v1611_v51 }
 0x1f6   :  { %855 = vperm.xlu0 %1289, %v600_v21  }
 0x1fa   :  { %1290 = vset.pattern.permute.xlu0 %v1601_v1  ;;  %v173_v1 = vadd.s32 256, %v1899_v58 }
 0x1fc   :  { %v1908_v3 = vand.u32 127, %v173_v1 }
 0x1fe   :  { %vm451_vm2 = vcmp.ge.s32.totalorder %v1908_v3, 2  ;;  %vm492_vm7 = vcmp.ge.s32.totalorder %v1908_v3, 1  ;;  %vm533_vm13 = vcmp.lt.s32.totalorder %v1908_v3, 127  ;;  %vm635_vm5 = vcmp.ge.s32.totalorder %v1908_v3, 9 }
 0x1ff   :  { %v1206_v15 = vsel %vm451_vm2, 1.0, %v1600_v0  ;;  %v1210_v35 = vsel %vm492_vm7, 1.0, %v1600_v0  ;;  %v1214_v25 = vsel %vm533_vm13, 1.0, %v1600_v0  ;;  %vm574_vm2 = vcmp.lt.s32.totalorder %v1908_v3, 126 }
 0x200   :  { %v1218_v8 = vsel %vm574_vm2, 1.0, %v1600_v0  ;;  %vm628_vm7 = vcmp.lt.s32.totalorder %v1899_v58, 9  ;;  %vm676_vm10 = vcmp.ge.s32.totalorder %v1908_v3, 6  ;;  %vm716_vm13 = vcmp.ge.s32.totalorder %v1906_v2, 3 }
 0x201   :  { %vm717_vm14 = vcmp.ge.s32.totalorder %v1908_v3, 3  ;;  %vm715_vm2 = vcmp.ge.s32.totalorder %v1899_v58, 3 }
 0x237   :  { %v478_v56 = vpop.permute.xlu1 %477  ;;  %v437_v57 = vpop.permute.xlu0 %436 }
 0x23b   :  { %v1901_v59 = vpop.permute.xlu1 %518  ;;  %v441_v61 = vpop.permute.xlu0 %440 }
 0x23f   :  { %v439_v62 = vpop.permute.xlu1 %438  ;;  %v1915_v7 = vpop.permute.xlu0 %481 }
 0x240   :  { %v447_v28 = vsel %vm444_vm4, %v437_v57, %v439_v62  ;;  %v446_v40 = vsel %vm444_vm4, %v439_v62, %v441_v61  ;;  %v1216_v62 = vsel %vm567_vm15, 1.0, %v1600_v0 }
 0x241   :  { %v462_v41 = vmul.f32 %v1205_v14, %v447_v28  ;;  %v463_v49 = vmul.f32 %v1206_v15, %v446_v40  ;;  %v1219_v40 = vsel %vm575_vm3, 1.0, %v1600_v0  ;;  %vm718_vm3 = vcmp.ge.s32.totalorder %v1910_v5, 3 }
 0x243   :  { %v443_v4 = vpop.permute.xlu1 %442  ;;  %v523_v31 = vpop.permute.xlu0 %522  ;;  %v470_v50 = vmul.f32 %v1891_v10, %v462_v41  ;;  %v471_v63 = vmul.f32 %v1891_v10, %v463_v49 }
 0x244   :  { %v448_v34 = vsel %vm444_vm4, %v443_v4, %v437_v57  ;;  %v445_v51 = vsel %vm444_vm4, %v441_v61, %v443_v4  ;;  %v1217_v61 = vsel %vm573_vm1, 1.0, %v1600_v0  ;;  %vm634_vm4 = vcmp.ge.s32.totalorder %v1906_v2, 9 }
 0x245   :  { %v461_v23 = vmul.f32 %v1204_v20, %v448_v34  ;;  %v474_v9 = vadd.f32 %v470_v50, %v433_v26  ;;  %v475_v41 = vadd.f32 %v471_v63, %v1928_v27  ;;  %vm710_vm1 = vcmp.lt.s32.totalorder %v1899_v58, 3 }
 0x247   :  { %v480_v13 = vpop.permute.xlu1 %479  ;;  %v560_v21 = vpop.permute.xlu0 %559  ;;  %v469_v52 = vmul.f32 %v1891_v10, %v461_v23 }
 0x248   :  { %v488_v39 = vsel %vm485_vm8, %v478_v56, %v480_v13  ;;  %v487_v43 = vsel %vm485_vm8, %v480_v13, %v1915_v7  ;;  %v464_v13 = vmul.f32 %v1207_v30, %v445_v51 }
 0x249   :  { %v503_v12 = vmul.f32 %v1209_v32, %v488_v39  ;;  %v504_v55 = vmul.f32 %v1210_v35, %v487_v43  ;;  %v473_v16 = vadd.f32 %v469_v52, %v432_v19 }
 0x24b   :  { %v484_v33 = vpop.permute.xlu1 %483  ;;  %v511_v14 = vmul.f32 %v1895_v54, %v503_v12  ;;  %v512_v20 = vmul.f32 %v1895_v54, %v504_v55  ;;  %v564_v28 = vpop.permute.xlu0 %563 }
 0x24c   :  { %v489_v44 = vsel %vm485_vm8, %v484_v33, %v478_v56  ;;  %v486_v4 = vsel %vm485_vm8, %v1915_v7, %v484_v33  ;;  %vm636_vm8 = vcmp.ge.s32.totalorder %v1910_v5, 9 }
 0x24d   :  { %v502_v22 = vmul.f32 %v1208_v38, %v489_v44  ;;  %v505_v35 = vmul.f32 %v1211_v36, %v486_v4  ;;  %v472_v36 = vmul.f32 %v1891_v10, %v464_v13  ;;  %v515_v44 = vadd.f32 %v511_v14, %v474_v9  ;;  %v1023_v4 = vld [vmem:[#allocation19] sm:$0xff] }
 0x24e   :  { %v516_v43 = vadd.f32 %v512_v20, %v475_v41 }
 0x24f   :  { %v521_v24 = vpop.permute.xlu1 %520  ;;  %v510_v6 = vmul.f32 %v1895_v54, %v502_v22  ;;  %v476_v50 = vadd.f32 %v472_v36, %v1942_v37  ;;  %v1220_v36 = vsel %vm633_vm6, 1.0, %v1600_v0  ;;  %vm758_vm6 = vcmp.lt.s32.totalorder %v1908_v3, 125 }
 0x250   :  { %v529_v47 = vsel %vm526_vm11, %v1901_v59, %v521_v24  ;;  %v528_v56 = vsel %vm526_vm11, %v521_v24, %v523_v31 }
 0x251   :  { %v543_v57 = vmul.f32 %v1212_v45, %v529_v47  ;;  %v544_v15 = vmul.f32 %v1213_v17, %v528_v56  ;;  %v514_v33 = vadd.f32 %v510_v6, %v473_v16  ;;  %v513_v47 = vmul.f32 %v1895_v54, %v505_v35  ;;  %v867_v6 = vld [vmem:[#allocation16] sm:$0xff] }
 0x253   :  { %v525_v60 = vpop.permute.xlu1 %524  ;;  %v517_v55 = vadd.f32 %v513_v47, %v476_v50 }
 0x254   :  { %v527_v1 = vsel %vm526_vm11, %v523_v31, %v525_v60  ;;  %v551_v31 = vmul.f32 %v1897_v11, %v543_v57  ;;  %v530_v7 = vsel %vm526_vm11, %v525_v60, %v1901_v59  ;;  %v552_v59 = vmul.f32 %v1897_v11, %v544_v15 }
 0x255   :  { %v545_v32 = vmul.f32 %v1214_v25, %v527_v1  ;;  %v546_v39 = vmul.f32 %v1215_v18, %v530_v7  ;;  %vm674_vm11 = vcmp.ge.s32.totalorder %v1899_v58, 6 }
 0x256   :  { %v555_v23 = vadd.f32 %v551_v31, %v514_v33  ;;  %v556_v51 = vadd.f32 %v552_v59, %v515_v44  ;;  %v1223_v59 = vsel %vm636_vm8, 1.0, %v1600_v0  ;;  %vm759_vm8 = vcmp.lt.s32.totalorder %v1910_v5, 125 }
 0x257   :  { %v562_v34 = vpop.permute.xlu1 %561  ;;  %v553_v45 = vmul.f32 %v1897_v11, %v545_v32  ;;  %v554_v12 = vmul.f32 %v1897_v11, %v546_v39 }
 0x258   :  { %v569_v26 = vsel %vm567_vm15, %v562_v34, %v564_v28  ;;  %v570_v30 = vsel %vm567_vm15, %v560_v21, %v562_v34 }
 0x259   :  { %v584_v19 = vmul.f32 %v1216_v62, %v570_v30  ;;  %v585_v38 = vmul.f32 %v1217_v61, %v569_v26  ;;  %v557_v52 = vadd.f32 %v553_v45, %v516_v43  ;;  %v558_v60 = vadd.f32 %v554_v12, %v517_v55 }
 0x25a   :  { %v1227_v43 = vsel %vm677_vm12, 1.0, %v1600_v0  ;;  %v1231_v55 = vsel %vm718_vm3, 1.0, %v1600_v0  ;;  %vm833_vm12 = vcmp.lt.s32.totalorder %v1899_v58, 119 }
 0x25b   :  { %v592_v17 = vmul.f32 %v1893_v53, %v584_v19  ;;  %v566_v24 = vpop.permute.xlu1 %565  ;;  %v593_v10 = vmul.f32 %v1893_v53, %v585_v38  ;;  %v1221_v19 = vsel %vm634_vm4, 1.0, %v1600_v0  ;;  %vm751_vm4 = vcmp.lt.s32.totalorder %v1899_v58, 125 }
 0x25c   :  { %v568_v25 = vsel %vm567_vm15, %v564_v28, %v566_v24  ;;  %v571_v27 = vsel %vm567_vm15, %v566_v24, %v560_v21  ;;  %v2022_v11 = vpop.permute.xlu0 %603  ;;  %vm669_vm15 = vcmp.lt.s32.totalorder %v1899_v58, 6  ;;  %v1224_v24 = vsel %vm674_vm11, 1.0, %v1600_v0 }
 0x25d   :  { %v2012_v49 = vadd.f32 %v592_v17, %v555_v23  ;;  %v586_v22 = vmul.f32 %v1218_v8, %v568_v25  ;;  %v587_v18 = vmul.f32 %v1219_v40, %v571_v27  ;;  %v2018_v56 = vadd.f32 %v593_v10, %v556_v51 }
 0x25e   :  { %v1222_v40 = vsel %vm635_vm5, 1.0, %v1600_v0  ;;  %v1225_v23 = vsel %vm675_vm9, 1.0, %v1600_v0  ;;  %v1226_v17 = vsel %vm676_vm10, 1.0, %v1600_v0  ;;  %v1229_v27 = vsel %vm716_vm13, 1.0, %v1600_v0 }
 0x25f   :  { %v594_v54 = vmul.f32 %v1893_v53, %v586_v22  ;;  %620 = vrot.lane.b32.xlu1 %v2012_v49, %s1612_s14  ;;  %v595_v21 = vmul.f32 %v1893_v53, %v587_v18  ;;  %v606_v41 = vmul.f32 %v2022_v11, %v2012_v49  ;;  %v607_v44 = vmul.f32 %v2022_v11, %v2018_v56 }
 0x260   :  { %v2105_v10 = vsel %vm717_vm14, 1.0, %v1600_v0  ;;  %vm757_vm5 = vcmp.lt.s32.totalorder %v1906_v2, 125  ;;  %vm792_vm9 = vcmp.lt.s32.totalorder %v1899_v58, 122  ;;  %vm798_vm10 = vcmp.lt.s32.totalorder %v1906_v2, 122 }
 0x261   :  { %v598_v57 = vadd.f32 %v594_v54, %v557_v52  ;;  %v599_v37 = vadd.f32 %v595_v21, %v558_v60  ;;  %v2044_v8 = vpop.permute.xlu0 %691  ;;  %v1228_v54 = vsel %vm715_vm2, 1.0, %v1600_v0  ;;  %v1232_v60 = vsel %vm751_vm4, 1.0, %v1600_v0 }
 0x262   :  { %vm800_vm11 = vcmp.lt.s32.totalorder %v1910_v5, 122  ;;  %vm839_vm13 = vcmp.lt.s32.totalorder %v1906_v2, 119  ;;  %vm840_vm14 = vcmp.lt.s32.totalorder %v1908_v3, 119 }
 0x263   :  { %624 = vrot.lane.b32.xlu0 %v598_v57, %s1612_s14  ;;  %622 = vrot.lane.b32.xlu1 %v2018_v56, %s1612_s14  ;;  %v608_v1 = vmul.f32 %v2022_v11, %v598_v57  ;;  %v609_v62 = vmul.f32 %v2022_v11, %v599_v37  ;;  %v2130_v11 = vsel %vm758_vm6, 1.0, %v1600_v0 }
 0x266   :  { %v2048_v13 = vpop.permute.xlu0 %732 }
 0x267   :  { %665 = vrot.lane.b32.xlu0 %v598_v57, %s1613_s4  ;;  %626 = vrot.lane.b32.xlu1 %v599_v37, %s1612_s14 }
 0x26b   :  { %706 = vrot.lane.b32.xlu0 %v598_v57, %s1614_s29  ;;  %661 = vrot.lane.b32.xlu1 %v2012_v49, %s1613_s4  ;;  %v2050_v16 = vpop.permute.xlu0 %773 }
 0x26c   :  { %v2027_v53 = vpop.permute.xlu1 %613 }
 0x26d   :  { %v2030_v61 = vadd.f32 %v2027_v53, %v608_v1  ;;  %v2033_v63 = vadd.f32 %v2027_v53, %v609_v62  ;;  %v2092_v39 = vadd.f32 %v2027_v53, %v606_v41  ;;  %v617_v25 = vadd.f32 %v2027_v53, %v607_v44 }
 0x26e   :  { %v2133_v1 = vsel %vm759_vm8, 1.0, %v1600_v0  ;;  %v1236_v62 = vsel %vm792_vm9, 1.0, %v1600_v0  ;;  %v1237_v53 = vsel %vm798_vm10, 1.0, %v1600_v0 }
 0x26f   :  { %747 = vrot.lane.b32.xlu0 %v598_v57, %s1615_s7  ;;  %663 = vrot.lane.b32.xlu1 %v2018_v56, %s1613_s4 }
 0x270   :  { %v2046_v9 = vpop.permute.xlu1 %650  ;;  %v2052_v28 = vpop.permute.xlu0 %814 }
 0x273   :  { %788 = vrot.lane.b32.xlu0 %v598_v57, %s1616_s0  ;;  %667 = vrot.lane.b32.xlu1 %v599_v37, %s1613_s4 }
 0x275   :  { %v2058_v34 = vpop.permute.xlu0 %855 }
 0x277   :  { %825 = vrot.lane.b32.xlu0 %v2012_v49, %s1617_s28  ;;  %702 = vrot.lane.b32.xlu1 %v2012_v49, %s1614_s29 }
 0x27b   :  { %829 = vrot.lane.b32.xlu0 %v598_v57, %s1617_s28  ;;  %704 = vrot.lane.b32.xlu1 %v2018_v56, %s1614_s29 }
 0x27f   :  { %708 = vrot.lane.b32.xlu1 %v599_v37, %s1614_s29  ;;  %870 = vperm.xlu0 %1290, %v867_v6  }
 0x283   :  { %743 = vrot.lane.b32.xlu1 %v2012_v49, %s1615_s7 }
 0x287   :  { %745 = vrot.lane.b32.xlu1 %v2018_v56, %s1615_s7 }
 0x28b   :  { %749 = vrot.lane.b32.xlu1 %v599_v37, %s1615_s7 }
 0x28f   :  { %784 = vrot.lane.b32.xlu1 %v2012_v49, %s1616_s0 }
 0x293   :  { %786 = vrot.lane.b32.xlu1 %v2018_v56, %s1616_s0 }
 0x297   :  { %790 = vrot.lane.b32.xlu1 %v599_v37, %s1616_s0 }
 0x29b   :  { %827 = vrot.lane.b32.xlu1 %v2018_v56, %s1617_s28 }
 0x29f   :  { %831 = vrot.lane.b32.xlu1 %v599_v37, %s1617_s28  ;;  %v1233_v37 = vsel %vm757_vm5, 1.0, %v1600_v0 }
 0x2a3   :  { %1026 = vperm.xlu1 %1284, %v1023_v4  }
 0x2d1   :  { %v621_v14 = vpop.permute.xlu1 %620 }
 0x2d5   :  { %v623_v15 = vpop.permute.xlu1 %622  ;;  %v625_v7 = vpop.permute.xlu0 %624 }
 0x2d6   :  { %v630_v49 = vsel %vm628_vm7, %v623_v15, %v625_v7  ;;  %v631_v22 = vsel %vm628_vm7, %v621_v14, %v623_v15 }
 0x2d7   :  { %v646_v12 = vmul.f32 %v1221_v19, %v631_v22  ;;  %v647_v52 = vmul.f32 %v1222_v40, %v630_v49 }
 0x2d9   :  { %v627_v20 = vpop.permute.xlu1 %626  ;;  %v2068_v33 = vpop.permute.xlu0 %665  ;;  %v654_v15 = vmul.f32 %v2046_v9, %v646_v12 }
 0x2da   :  { %v629_v18 = vsel %vm628_vm7, %v625_v7, %v627_v20  ;;  %v632_v50 = vsel %vm628_vm7, %v627_v20, %v621_v14  ;;  %vm799_vm7 = vcmp.lt.s32.totalorder %v1908_v3, 122  ;;  %v655_v20 = vmul.f32 %v2046_v9, %v647_v52 }
 0x2db   :  { %v645_v56 = vmul.f32 %v1220_v36, %v632_v50  ;;  %v648_v21 = vmul.f32 %v1223_v59, %v629_v18  ;;  %v658_v18 = vadd.f32 %v654_v15, %v617_v25 }
 0x2dc   :  { %v659_v50 = vadd.f32 %v655_v20, %v2030_v61 }
 0x2dd   :  { %v2054_v31 = vpop.permute.xlu1 %661  ;;  %v2094_v45 = vpop.permute.xlu0 %706  ;;  %v653_v7 = vmul.f32 %v2046_v9, %v645_v56  ;;  %v656_v19 = vmul.f32 %v2046_v9, %v648_v21 }
 0x2df   :  { %v657_v56 = vadd.f32 %v653_v7, %v2092_v39  ;;  %v660_v21 = vadd.f32 %v656_v19, %v2033_v63 }
 0x2e1   :  { %v2056_v32 = vpop.permute.xlu1 %663  ;;  %v748_v57 = vpop.permute.xlu0 %747 }
 0x2e2   :  { %v672_v4 = vsel %vm669_vm15, %v2054_v31, %v2056_v32 }
 0x2e3   :  { %v687_v41 = vmul.f32 %v1225_v23, %v672_v4  ;;  %v1241_v23 = vsel %vm839_vm13, 1.0, %v1600_v0 }
 0x2e5   :  { %v2060_v35 = vpop.permute.xlu1 %667  ;;  %v789_v44 = vpop.permute.xlu0 %788  ;;  %v695_v4 = vmul.f32 %v2044_v8, %v687_v41 }
 0x2e6   :  { %v673_v6 = vsel %vm669_vm15, %v2060_v35, %v2054_v31  ;;  %v671_v31 = vsel %vm669_vm15, %v2056_v32, %v2068_v33  ;;  %v670_v40 = vsel %vm669_vm15, %v2068_v33, %v2060_v35  ;;  %v1238_v32 = vsel %vm799_vm7, 1.0, %v1600_v0 }
 0x2e7   :  { %v686_v36 = vmul.f32 %v1224_v24, %v673_v6  ;;  %v1239_v35 = vsel %vm800_vm11, 1.0, %v1600_v0  ;;  %v1240_v33 = vsel %vm833_vm12, 1.0, %v1600_v0  ;;  %v688_v24 = vmul.f32 %v1226_v17, %v671_v31 }
 0x2e8   :  { %v689_v49 = vmul.f32 %v1227_v43, %v670_v40  ;;  %vm841_vm15 = vcmp.lt.s32.totalorder %v1910_v5, 119  ;;  %v699_v19 = vadd.f32 %v695_v4, %v658_v18  ;;  %v1242_v4 = vsel %vm840_vm14, 1.0, %v1600_v0 }
 0x2e9   :  { %v2062_v26 = vpop.permute.xlu1 %702  ;;  %v694_v17 = vmul.f32 %v2044_v8, %v686_v36  ;;  %v826_v15 = vpop.permute.xlu0 %825 }
 0x2eb   :  { %v698_v31 = vadd.f32 %v694_v17, %v657_v56 }
 0x2ed   :  { %v2064_v30 = vpop.permute.xlu1 %704 }
 0x2ee   :  { %v713_v2 = vsel %vm710_vm1, %v2062_v26, %v2064_v30  ;;  %v712_v43 = vsel %vm710_vm1, %v2064_v30, %v2094_v45 }
 0x2ef   :  { %v728_v12 = vmul.f32 %v1229_v27, %v713_v2  ;;  %v696_v27 = vmul.f32 %v2044_v8, %v688_v24 }
 0x2f1   :  { %v2075_v38 = vpop.permute.xlu1 %708  ;;  %v736_v30 = vmul.f32 %v2048_v13, %v728_v12 }
 0x2f2   :  { %v714_v9 = vsel %vm710_vm1, %v2075_v38, %v2062_v26  ;;  %v711_v61 = vsel %vm710_vm1, %v2094_v45, %v2075_v38 }
 0x2f3   :  { %v727_v52 = vmul.f32 %v1228_v54, %v714_v9 }
 0x2f5   :  { %v2099_v47 = vpop.permute.xlu1 %743  ;;  %v735_v20 = vmul.f32 %v2048_v13, %v727_v52 }
 0x2f9   :  { %v746_v51 = vpop.permute.xlu1 %745 }
 0x2fa   :  { %v753_v26 = vsel %vm751_vm4, %v746_v51, %v748_v57  ;;  %v754_v22 = vsel %vm751_vm4, %v2099_v47, %v746_v51  ;;  %v697_v51 = vmul.f32 %v2044_v8, %v689_v49  ;;  %v729_v8 = vmul.f32 %v2105_v10, %v712_v43 }
 0x2fb   :  { %v768_v39 = vmul.f32 %v1232_v60, %v754_v22  ;;  %v769_v63 = vmul.f32 %v1233_v37, %v753_v26  ;;  %v730_v60 = vmul.f32 %v1231_v55, %v711_v61  ;;  %v700_v10 = vadd.f32 %v696_v27, %v659_v50  ;;  %v830_v26 = vpop.permute.xlu0 %829 }
 0x2fc   :  { %v701_v55 = vadd.f32 %v697_v51, %v660_v21 }
 0x2fd   :  { %v750_v14 = vpop.permute.xlu1 %749  ;;  %v776_v40 = vmul.f32 %v2050_v16, %v768_v39  ;;  %v777_v41 = vmul.f32 %v2050_v16, %v769_v63  ;;  %v738_v24 = vmul.f32 %v2048_v13, %v730_v60 }
 0x2fe   :  { %v752_v38 = vsel %vm751_vm4, %v748_v57, %v750_v14  ;;  %v755_v45 = vsel %vm751_vm4, %v750_v14, %v2099_v47  ;;  %v737_v14 = vmul.f32 %v2048_v13, %v729_v8 }
 0x2ff   :  { %v770_v2 = vmul.f32 %v2130_v11, %v752_v38  ;;  %v771_v57 = vmul.f32 %v2133_v1, %v755_v45  ;;  %v742_v17 = vadd.f32 %v738_v24, %v701_v55  ;;  %v871_v58 = vpop.permute.xlu0 %870  ;;  %v1308_v24 = vld [vmem:[#allocation2 + $0x8] sm:$0xff] }
 0x301   :  { %v785_v59 = vpop.permute.xlu1 %784  ;;  %v779_v50 = vmul.f32 %v2050_v16, %v771_v57  ;;  %v1022_v57 = vld [vmem:[#allocation17] sm:$0xff] }
 0x303   :  { %v783_v3 = vadd.f32 %v779_v50, %v742_v17 }
 0x305   :  { %v787_v25 = vpop.permute.xlu1 %786 }
 0x306   :  { %v794_v54 = vsel %vm792_vm9, %v787_v25, %v789_v44  ;;  %v795_v6 = vsel %vm792_vm9, %v785_v59, %v787_v25 }
 0x307   :  { %v809_v37 = vmul.f32 %v1236_v62, %v795_v6  ;;  %v810_v7 = vmul.f32 %v1237_v53, %v794_v54  ;;  %v740_v62 = vadd.f32 %v736_v30, %v699_v19  ;;  %v739_v53 = vadd.f32 %v735_v20, %v698_v31  ;;  %v866_v20 = vld [vmem:[#allocation14] sm:$0xff] }
 0x309   :  { %v791_v36 = vpop.permute.xlu1 %790  ;;  %v817_v49 = vmul.f32 %v2052_v28, %v809_v37  ;;  %v818_v11 = vmul.f32 %v2052_v28, %v810_v7  ;;  %v780_v1 = vadd.f32 %v776_v40, %v739_v53  ;;  %v781_v22 = vadd.f32 %v777_v41, %v740_v62  ;;  %v1307_v53 = vld [vmem:[#allocation2] sm:$0xff] }
 0x30a   :  { %v793_v9 = vsel %vm792_vm9, %v789_v44, %v791_v36  ;;  %v796_v47 = vsel %vm792_vm9, %v791_v36, %v785_v59  ;;  %v778_v59 = vmul.f32 %v2050_v16, %v770_v2 }
 0x30b   :  { %v811_v18 = vmul.f32 %v1238_v32, %v793_v9  ;;  %v812_v44 = vmul.f32 %v1239_v35, %v796_v47  ;;  %v1243_v32 = vsel %vm841_vm15, 1.0, %v1600_v0  ;;  %v741_v35 = vadd.f32 %v737_v14, %v700_v10 }
 0x30c   :  { %v821_v43 = vadd.f32 %v817_v49, %v780_v1  ;;  %v822_v16 = vadd.f32 %v818_v11, %v781_v22  ;;  %v1309_v1 = vld [vmem:[#allocation2 + $0x10] sm:$0xff] }
 0x30d   :  { %v828_v12 = vpop.permute.xlu1 %827  ;;  %v819_v61 = vmul.f32 %v2052_v28, %v811_v18  ;;  %v820_v39 = vmul.f32 %v2052_v28, %v812_v44  ;;  %v782_v25 = vadd.f32 %v778_v59, %v741_v35  ;;  %v1310_v18 = vld [vmem:[#allocation2 + $0x18] sm:$0xff] }
 0x30e   :  { %v835_v52 = vsel %vm833_vm12, %v828_v12, %v830_v26  ;;  %v836_v13 = vsel %vm833_vm12, %v826_v15, %v828_v12 }
 0x30f   :  { %v850_v56 = vmul.f32 %v1240_v33, %v836_v13  ;;  %v851_v21 = vmul.f32 %v1241_v23, %v835_v52  ;;  %v823_v38 = vadd.f32 %v819_v61, %v782_v25  ;;  %v824_v8 = vadd.f32 %v820_v39, %v783_v3 }
 0x311   :  { %v858_v63 = vmul.f32 %v2058_v34, %v850_v56  ;;  %v859_v33 = vmul.f32 %v2058_v34, %v851_v21  ;;  %v832_v23 = vpop.permute.xlu1 %831 }
 0x312   :  { %v834_v27 = vsel %vm833_vm12, %v830_v26, %v832_v23  ;;  %v837_v5 = vsel %vm833_vm12, %v832_v23, %v826_v15 }
 0x313   :  { %v862_v51 = vadd.f32 %v858_v63, %v821_v43  ;;  %v852_v54 = vmul.f32 %v1242_v4, %v834_v27  ;;  %v853_v6 = vmul.f32 %v1243_v32, %v837_v5  ;;  %v863_v30 = vadd.f32 %v859_v33, %v822_v16 }
 0x315   :  { %v860_v28 = vmul.f32 %v2058_v34, %v852_v54  ;;  %v861_v45 = vmul.f32 %v2058_v34, %v853_v6  ;;  %876 = vmatprep.subr.mxu0 %v863_v30 }
 0x316   :  { %877 = vmatpush1.msra.mxu0 %v862_v51 }
 0x317   :  { %v864_v60 = vadd.f32 %v860_v28, %v823_v38  ;;  %1244 = vmatmul.mubr.msk.f32.vlgmr.msra.gmra.mrb[2].mxu0 %vm186_vm0, %v866_v20  ;;  %v865_v37 = vadd.f32 %v861_v45, %v824_v8 }
 0x318   :  { %1096 = vmatprep.mubr.f32.mxu0 %v1600_v0 }
 0x319   :  { %947 = vmatprep.subr.mxu1 %v865_v37 }
 0x31a   :  { %948 = vmatpush1.msra.mxu1 %v864_v60 }
 0x31b   :  { %1245 = vmatmul.mubr.msk.f32.vlgmr.msra.gmra.mrb[2].mxu1 %vm186_vm0, %v866_v20 }
 0x31c   :  { %1167 = vmatprep.mubr.f32.mxu1 %v1600_v0 }
 0x3ea   :  { %v942_v15 = vpop.f32.mrb[2].mxu0 }
 0x3eb   :  { %v943_v7 = vadd.f32 %v942_v15, %v871_v58  ;;  %v944_v19 = vpop.f32.mrb[3].mxu0 }
 0x3ec   :  { %v945_v34 = vadd.f32 %v944_v19, %v871_v58 }
 0x3ed   :  { %v1018_v41 = vmul.f32 %v943_v7, %v1856_v42 }
 0x3ee   :  { %v1019_v31 = vmul.f32 %v945_v34, %v1870_v48  ;;  %v1013_v40 = vpop.f32.mrb[2].mxu1  ;;  %v1027_v48 = vpop.permute.xlu1 %1026 }
 0x3ef   :  { %v1014_v36 = vadd.f32 %v1013_v40, %v871_v58  ;;  %v1015_v2 = vpop.f32.mrb[3].mxu1 }
 0x3f0   :  { %v1016_v9 = vadd.f32 %v1015_v2, %v871_v58  ;;  %1032 = vmatprep.subr.mxu0 %v1019_v31 }
 0x3f1   :  { %1033 = vmatpush1.msra.mxu0 %v1018_v41  ;;  %v1020_v0 = vmul.f32 %v1014_v36, %v1865_v46 }
 0x3f2   :  { %v1021_v47 = vmul.f32 %v1016_v9, %v1875_v29  ;;  %1246 = vmatmul.mubr.msk.f32.vlgmr.msra.gmra.mrb[4].mxu0 %vm186_vm0, %v1022_v57 }
 0x3f4   :  { %1103 = vmatprep.subr.mxu1 %v1021_v47 }
 0x3f5   :  { %1104 = vmatpush1.msra.mxu1 %v1020_v0 }
 0x3f6   :  { %1247 = vmatmul.mubr.msk.f32.vlgmr.msra.gmra.mrb[4].mxu1 %vm186_vm0, %v1022_v57 }
 0x4c5   :  { %v1098_v10 = vpop.f32.mrb[4].mxu0 }
 0x4c6   :  { %v1099_v55 = vadd.f32 %v1098_v10, %v1027_v48  ;;  %v1100_v42 = vpop.f32.mrb[5].mxu0 }
 0x4c7   :  { %v1101_v62 = vadd.f32 %v1100_v42, %v1027_v48 }
 0x4c8   :  { %v1174_v14 = vadd.f32 %v1307_v53, %v1099_v55 }
 0x4c9   :  { %v1175_v49 = vadd.f32 %v1308_v24, %v1101_v62  ;;  %v1169_v11 = vpop.f32.mrb[4].mxu1 }
 0x4ca   :  { %1178 = vst [vmem:[#allocation20] sm:$0xff] %v1174_v14  ;;  %v1170_v29 = vadd.f32 %v1169_v11, %v1027_v48  ;;  %v1171_v26 = vpop.f32.mrb[5].mxu1 }
 0x4cb   :  { %1179 = vst [vmem:[#allocation20 + $0x8] sm:$0xff] %v1175_v49  ;;  %v1172_v46 = vadd.f32 %v1171_v26, %v1027_v48 }
 0x4cc   :  { %v1176_v22 = vadd.f32 %v1309_v1, %v1170_v29 }
 0x4cd   :  { %v1177_v44 = vadd.f32 %v1310_v18, %v1172_v46 }
 0x4ce   :  { %1180 = vst [vmem:[#allocation20 + $0x10] sm:$0xff] %v1176_v22 }
 0x4cf   :  { %1181 = vst [vmem:[#allocation20 + $0x18] sm:$0xff] %v1177_v44 }
 0x4d0   :  { %1564 = shalt.err (!%p1561_p8)
}
 0x4d1   :  { %s1565_s21 = scalar_lea.hbm %s2282_s11, 512 }
 0x4d2   :  { %p1566_p9 = scmp.ne.s32.totalorder %s2282_s11, %s1565_s21  ;;  %p1569_p10 = scmp.lt.u32.totalorder %s1565_s21, %s2282_s11 }
 0x4d4   :  { %p1571_p11 = pnand %p1569_p10, %p1566_p9 }
 0x4d6   :  { %1574 = shalt.err (!%p1571_p11)
}
 0x4d7   :  { %1191 = dma.vmem_to_hbm [thread:$0]  %s1189_s15, 512, %s2282_s11, [#allocation4]  }
 0x4d8   :  { %1587 = dma.done.wait [#allocation4], 512  }
 0x4d9   :  { %1588 = vsyncadd [#allocation4], 4294966784 }
 0x4da   :  { %1195 = vsyncpa [#allocation3], 1 }
 0x4db   :  { %1196 = vsyncpa [#allocation6], 1 }
 0x4dc   :  { %1197 = vsyncpa [#allocation9], 1 }
 0x4dd   :  { %1198 = vsyncpa [#allocation12], 1 }
 0x4de   :  { %1199 = vsyncpa [#allocation15], 1 }
 0x4df   :  { %1200 = vsyncpa [#allocation18], 1 }
 0x4e0   :  { %1201 = vsyncpa [#allocation4], 1 }

</bundles_post_ra>
